<compile_context>
chip_gen: v5e
topology: v5e:2x2
jax: 0.10.0
libtpu: 0.0.40
codegen_flags: <defaults>
</compile_context>

<pallas_src>
import functools

import jax
import jax.numpy as jnp
from jax import lax
from jax.experimental import pallas as pl
from jax.experimental.pallas import tpu as pltpu

EPSILON = 1e-8
NZ = 32          # latent / style dimension (small, per task instructions)
NF = 64          # SynthesisNetwork.nf
BLOCK_CFG = [    # (in_channels, out_channels, upsample) -- fixed by the module definition
    (NF, 512, False),
    (512, 256, True),
    (256, 256, False),
    (256, 128, True),
    (128, 128, False),
    (128, 64, True),
    (64, 64, False),
    (64, 32, True),
    (32, 32, False),
]
RGB_IN = 32

# Scoped-VMEM limit: 3/4 of physical VMEM, capped, with a universally safe fallback.
try:
    VMEM_LIMIT = int(min(96 * 1024 * 1024,
                         (3 * pltpu.get_tpu_info().vmem_capacity_bytes) // 4))
except Exception:
    VMEM_LIMIT = 32 * 1024 * 1024


# --------------------------------------------------------------------------------------
# Pallas kernels
# --------------------------------------------------------------------------------------
def _genblock_kernel(style_ref, xflat_ref, a_ref, bsc_ref, wtap_ref, wsq_ref,
                     noise_ref, ns_ref, out_ref, *, taps, guard, n_rows):
    """One GeneratorBlock for one sample (fused modulated 3x3 conv + demod + noise + LReLU).

    xflat_ref : (n_rows + 2*guard, Cin)  zero-padded, spatially flattened input
    out_ref   : (n_rows, Cout)           flattened padded output grid (interior rows valid)
    """
    b = pl.program_id(0)
    # style -> per-input-channel modulation scale  s = style @ W_sc^T + 1
    sty = style_ref[pl.ds(b, 1), :]                                               # (1, nz)
    s = jnp.dot(sty, a_ref[...], preferred_element_type=jnp.float32) + bsc_ref[...]  # (1, Cin)
    # demodulation scale d[o] = rsqrt(sum_i s_i^2 * sum_kk W[o,i,kk]^2 + eps)
    d = lax.rsqrt(jnp.dot(s * s, wsq_ref[...],
                          preferred_element_type=jnp.float32) + EPSILON)          # (1, Cout)

    cout = out_ref.shape[-1]
    acc = jnp.zeros((n_rows, cout), jnp.float32)
    # 3x3 conv == 9 row-shifted matmuls on the flattened padded grid (MXU).
    for t, delta in enumerate(taps):
        start = guard + delta
        patch = xflat_ref[start:start + n_rows, :] * s        # modulate input channels
        acc = acc + jnp.dot(patch, wtap_ref[t], preferred_element_type=jnp.float32)

    y = acc * d                                               # demodulate (per out channel)
    y = y + ns_ref[0] * noise_ref[...]                        # per-pixel noise, bcast over C
    out_ref[...] = jnp.where(y >= 0.0, y, 0.2 * y)            # LeakyReLU(0.2)


def _rgb_kernel(style_ref, xflat_ref, a_ref, bsc_ref, w_ref, out_ref):
    """RGBBlock: 1x1 modulated conv (no demodulation) fused with the final tanh."""
    b = pl.program_id(0)
    sty = style_ref[pl.ds(b, 1), :]
    s = jnp.dot(sty, a_ref[...], preferred_element_type=jnp.float32) + bsc_ref[...]
    y = jnp.dot(xflat_ref[...] * s, w_ref[...], preferred_element_type=jnp.float32)
    out_ref[...] = jnp.tanh(y)


# --------------------------------------------------------------------------------------
# Pallas wrappers (layout plumbing: pad / flatten in JAX, compute in the kernel)
# --------------------------------------------------------------------------------------
def generator_block_call(x, style, p, noise):
    """x: (B,H,W,Cin) channels-last, style: (B,NZ), noise: (B,H,W,1) -> (B,H,W,Cout)."""
    B, H, W, cin = x.shape
    cout = p["w_taps"].shape[-1]
    nz = style.shape[1]
    hp, wp = H + 2, W + 2
    n_rows = hp * wp
    guard = wp + 1            # max |row shift| of a 3x3 tap on the flattened grid

    # zero-pad spatially, flatten (H+2, W+2) -> rows, add guard rows so all nine
    # row-shifted tap windows stay in bounds.  Interior rows of the output are valid.
    xp = jnp.pad(x, ((0, 0), (1, 1), (1, 1), (0, 0))).reshape(B, n_rows, cin)
    xp = jnp.pad(xp, ((0, 0), (guard, guard), (0, 0)))
    nflat = jnp.pad(noise, ((0, 0), (1, 1), (1, 1), (0, 0))).reshape(B, n_rows, 1)

    taps = tuple((ky - 1) * wp + (kx - 1) for ky in range(3) for kx in range(3))
    kernel = functools.partial(_genblock_kernel, taps=taps, guard=guard, n_rows=n_rows)

    out = pl.pallas_call(
        kernel,
        out_shape=jax.ShapeDtypeStruct((B, n_rows, cout), jnp.float32),
        grid=(B,),
        in_specs=[
            pl.BlockSpec((B, nz), lambda b: (0, 0)),                          # styles (resident)
            pl.BlockSpec((None, n_rows + 2 * guard, cin), lambda b: (b, 0, 0)),
            pl.BlockSpec((nz, cin), lambda b: (0, 0)),                        # style Linear W^T
            pl.BlockSpec((1, cin), lambda b: (0, 0)),                         # style Linear bias
            pl.BlockSpec((9, cin, cout), lambda b: (0, 0, 0)),                # conv taps (resident)
            pl.BlockSpec((cin, cout), lambda b: (0, 0)),                      # sum_kk W^2
            pl.BlockSpec((None, n_rows, 1), lambda b: (b, 0, 0)),             # noise map
            pl.BlockSpec(memory_space=pltpu.MemorySpace.SMEM),                # noise_strength
        ],
        out_specs=pl.BlockSpec((None, n_rows, cout), lambda b: (b, 0, 0)),
        compiler_params=pltpu.CompilerParams(
            dimension_semantics=("parallel",),       # batch across TensorCores (v7x megacore)
            vmem_limit_bytes=VMEM_LIMIT,
        ),
    )(style, xp, p["A"], p["b2"], p["w_taps"], p["wsq"], nflat, p["noise_strength"])

    # keep the interior of the padded output grid
    return out.reshape(B, hp, wp, cout)[:, 1:1 + H, 1:1 + W, :]


def rgb_block_call(x, style, p):
    """x: (B,H,W,32), style: (B,NZ) -> tanh(1x1 modulated conv), (B,H,W,3)."""
    B, H, W, cin = x.shape
    nz = style.shape[1]
    n_rows = H * W
    xflat = x.reshape(B, n_rows, cin)
    out = pl.pallas_call(
        _rgb_kernel,
        out_shape=jax.ShapeDtypeStruct((B, n_rows, 3), jnp.float32),
        grid=(B,),
        in_specs=[
            pl.BlockSpec((B, nz), lambda b: (0, 0)),
            pl.BlockSpec((None, n_rows, cin), lambda b: (b, 0, 0)),
            pl.BlockSpec((nz, cin), lambda b: (0, 0)),
            pl.BlockSpec((1, cin), lambda b: (0, 0)),
            pl.BlockSpec((cin, 3), lambda b: (0, 0)),
        ],
        out_specs=pl.BlockSpec((None, n_rows, 3), lambda b: (b, 0, 0)),
        compiler_params=pltpu.CompilerParams(
            dimension_semantics=("parallel",),
            vmem_limit_bytes=VMEM_LIMIT,
        ),
    )(style, xflat, p["A"], p["b2"], p["w_mat"])
    return out.reshape(B, H, W, 3)


# --------------------------------------------------------------------------------------
# TODO(synk): nn.Upsample(scale_factor=2, mode='bilinear', align_corners=False) between
# blocks is done in plain JAX (exact PyTorch interpolation weights), not as a Pallas kernel.
# --------------------------------------------------------------------------------------
def _upsample2x_axis(x, axis):
    n = x.shape[axis]
    idx = jnp.arange(n)
    x_prev = jnp.take(x, jnp.maximum(idx - 1, 0), axis=axis)
    x_next = jnp.take(x, jnp.minimum(idx + 1, n - 1), axis=axis)
    even = 0.25 * x_prev + 0.75 * x          # matches torch half-pixel, align_corners=False
    odd = 0.75 * x + 0.25 * x_next
    y = jnp.stack([even, odd], axis=axis + 1)
    shape = list(x.shape)
    shape[axis] = 2 * n
    return y.reshape(shape)


def upsample2x_bilinear(x):  # (B, H, W, C) -> (B, 2H, 2W, C)
    return _upsample2x_axis(_upsample2x_axis(x, 1), 2)


# --------------------------------------------------------------------------------------
# Parameter init (mimics the PyTorch module's initialisers, deterministic)
# --------------------------------------------------------------------------------------
def _init_modconv(key, in_chan, out_chan, kernel):
    kw, ks = jax.random.split(key)
    fan_in = in_chan * kernel * kernel
    std = (2.0 / fan_in) ** 0.5                       # kaiming_normal_, leaky_relu a=0
    weight = std * jax.random.normal(kw, (out_chan, in_chan, kernel, kernel), jnp.float32)
    bound = 1.0 / (NZ ** 0.5)                         # nn.Linear default weight init
    sc_w = jax.random.uniform(ks, (in_chan, NZ), jnp.float32, -bound, bound)
    sc_b = jnp.ones((in_chan,), jnp.float32)          # bias explicitly set to ones
    return weight, sc_w, sc_b


def _init_block(key, in_chan, out_chan, upsample):
    weight, sc_w, sc_b = _init_modconv(key, in_chan, out_chan, 3)
    return dict(
        upsample=upsample,
        weight=weight, sc_w=sc_w, sc_b=sc_b,                        # torch layout (reference)
        noise_strength=jnp.zeros((1,), jnp.float32),
        # kernel-layout views
        A=jnp.transpose(sc_w),                                      # (NZ, Cin)
        b2=sc_b.reshape(1, in_chan),                                # (1, Cin)
        w_taps=jnp.transpose(weight, (2, 3, 1, 0)).reshape(9, in_chan, out_chan),
        wsq=jnp.transpose(jnp.sum(weight * weight, axis=(2, 3))),   # (Cin, Cout)
    )


def _init_rgb(key, in_chan):
    weight, sc_w, sc_b = _init_modconv(key, in_chan, 3, 1)
    return dict(
        weight=weight, sc_w=sc_w, sc_b=sc_b,
        A=jnp.transpose(sc_w),
        b2=sc_b.reshape(1, in_chan),
        w_mat=jnp.transpose(weight[:, :, 0, 0]),                    # (Cin, 3)
    )


def init_params(key):
    keys = jax.random.split(key, len(BLOCK_CFG) + 2)
    const = jax.random.normal(keys[0], (NF, 4, 4), jnp.float32)
    blocks = [_init_block(k, ci, co, up)
              for k, (ci, co, up) in zip(keys[1:-1], BLOCK_CFG)]
    rgb = _init_rgb(keys[-1], RGB_IN)
    return dict(const=jnp.transpose(const, (1, 2, 0)), blocks=blocks, rgb=rgb)


# --------------------------------------------------------------------------------------
# Pure-JAX reference of the original formulation (per-sample modulated weights + lax.conv)
# --------------------------------------------------------------------------------------
def _ref_modulated_conv(x, style, weight, sc_w, sc_b, demodulate, pad):
    s = jnp.dot(style, sc_w.T, precision=lax.Precision.HIGHEST) + sc_b        # (B, Cin)
    w = s[:, None, :, None, None] * weight[None]                              # (B,Cout,Cin,k,k)
    if demodulate:
        d = lax.rsqrt(jnp.sum(w * w, axis=(2, 3, 4), keepdims=True) + EPSILON)
        w = w * d
    outs = []
    for b in range(x.shape[0]):                                               # groups=B
        outs.append(lax.conv_general_dilated(
            x[b:b + 1], w[b], (1, 1), [(pad, pad), (pad, pad)],
            dimension_numbers=("NHWC", "OIHW", "NHWC"),
            precision=lax.Precision.HIGHEST))
    return jnp.concatenate(outs, axis=0)


def _ref_generator_block(x, style, p, noise):
    y = _ref_modulated_conv(x, style, p["weight"], p["sc_w"], p["sc_b"], True, 1)
    y = y + p["noise_strength"][0] * noise
    return jnp.where(y >= 0.0, y, 0.2 * y)


def _ref_rgb_block(x, style, p):
    y = _ref_modulated_conv(x, style, p["weight"], p["sc_w"], p["sc_b"], False, 0)
    return jnp.tanh(y)


def _check_close(got, want, name):
    rel = float(jnp.linalg.norm(got - want) / (jnp.linalg.norm(want) + 1e-12))
    assert rel < 5e-2, f"{name}: relative error {rel:.3e}"


# --------------------------------------------------------------------------------------
# Full forward pass (matches SynthesisNetwork.forward; the owned-but-unused mapper is skipped)
# --------------------------------------------------------------------------------------
def synthesis_forward(styles, params, noises, ref_check=False):
    """styles: (B, n_blocks, NZ) -> rgb: (B, 64, 64, 3) channels-last."""
    B = styles.shape[0]
    x = jnp.broadcast_to(params["const"][None], (B, 4, 4, NF))
    for j, p in enumerate(params["blocks"]):
        sty = styles[:, j, :]
        if p["upsample"]:
            x = upsample2x_bilinear(x)
        y = generator_block_call(x, sty, p, noises[j])
        if ref_check:
            _check_close(y, _ref_generator_block(x, sty, p, noises[j]), f"block{j}")
        x = y
    sty = styles[:, -1, :]
    rgb = rgb_block_call(x, sty, params["rgb"])
    if ref_check:
        _check_close(rgb, _ref_rgb_block(x, sty, params["rgb"]), "rgb")
    return rgb


if __name__ == "__main__":
    B = 2
    key = jax.random.PRNGKey(0)
    k_par, k_sty, k_noise = jax.random.split(key, 3)

    params = init_params(k_par)
    n_blocks = len(BLOCK_CFG)
    styles = jax.random.normal(k_sty, (B, n_blocks, NZ), jnp.float32)

    # per-block noise maps (== torch.randn((B, 1, H, W)), in channels-last layout)
    sizes, s = [], 4
    for (_, _, up) in BLOCK_CFG:
        s = s * 2 if up else s
        sizes.append(s)
    noises = [jax.random.normal(k, (B, sz, sz, 1), jnp.float32)
              for k, sz in zip(jax.random.split(k_noise, n_blocks), sizes)]

    rgb = synthesis_forward(styles, params, noises, ref_check=True)
    rgb = jax.block_until_ready(rgb)

    assert rgb.shape == (B, 64, 64, 3)
    assert bool(jnp.all(jnp.isfinite(rgb)))
    assert bool(jnp.all(jnp.abs(rgb) <= 1.0 + 1e-5))
    print("KERNEL_OK")
</pallas_src>

<mosaic_0001>
module attributes {stable_mosaic.version = 11 : i64} {
  func.func @_genblock_kernel(%arg0: i32, %arg1: memref<2x32xf32, #tpu.memory_space<vmem>>, %arg2: memref<1x50x64xf32, #tpu.memory_space<vmem>>, %arg3: memref<32x64xf32, #tpu.memory_space<vmem>>, %arg4: memref<1x64xf32, #tpu.memory_space<vmem>>, %arg5: memref<9x64x512xf32, #tpu.memory_space<vmem>>, %arg6: memref<64x512xf32, #tpu.memory_space<vmem>>, %arg7: memref<1x36x1xf32, #tpu.memory_space<vmem>>, %arg8: memref<1xf32, #tpu.memory_space<smem>>, %arg9: memref<1x36x512xf32, #tpu.memory_space<vmem>>) attributes {dimension_semantics = [#tpu.dimension_semantics<parallel>], iteration_bounds = array<i64: 2>, scalar_prefetch = 0 : i64, scratch_operands = 0 : i64, tpu.core_type = #tpu.core_type<tc>, window_params = [{pipeline_mode = #tpu.pipeline_mode<synchronous>, transform_indices = @transform_0, window_bounds = array<i64: 2, 32>}, {transform_indices = @transform_1, window_bounds = array<i64: 1, 50, 64>}, {pipeline_mode = #tpu.pipeline_mode<synchronous>, transform_indices = @transform_2, window_bounds = array<i64: 32, 64>}, {pipeline_mode = #tpu.pipeline_mode<synchronous>, transform_indices = @transform_3, window_bounds = array<i64: 1, 64>}, {pipeline_mode = #tpu.pipeline_mode<synchronous>, transform_indices = @transform_4, window_bounds = array<i64: 9, 64, 512>}, {pipeline_mode = #tpu.pipeline_mode<synchronous>, transform_indices = @transform_5, window_bounds = array<i64: 64, 512>}, {transform_indices = @transform_6, window_bounds = array<i64: 1, 36, 1>}, {transform_indices = @transform_7, window_bounds = array<i64: 1>}, {transform_indices = @transform_8, window_bounds = array<i64: 1, 36, 512>}]} {
    %0 = arith.index_cast %arg0 : i32 to index
    %c0 = arith.constant 0 : index
    %1 = vector.load %arg1[%0, %c0] : memref<2x32xf32, #tpu.memory_space<vmem>>, vector<1x32xf32>
    %c0_0 = arith.constant 0 : index
    %c0_1 = arith.constant 0 : index
    %2 = vector.load %arg3[%c0_0, %c0_1] : memref<32x64xf32, #tpu.memory_space<vmem>>, vector<32x64xf32>
    %cst = arith.constant dense<0.000000e+00> : vector<1x64xf32>
    %3 = tpu.matmul %1, %2, %cst {dimension_numbers = #tpu.dot_dimension_numbers<[1], [0], [0], [1], [0, 0, 1, 1], [], []>} : vector<1x32xf32>, vector<32x64xf32>, vector<1x64xf32> -> vector<1x64xf32>
    %c0_2 = arith.constant 0 : index
    %c0_3 = arith.constant 0 : index
    %4 = vector.load %arg4[%c0_2, %c0_3] : memref<1x64xf32, #tpu.memory_space<vmem>>, vector<1x64xf32>
    %5 = arith.addf %3, %4 : vector<1x64xf32>
    %6 = arith.mulf %5, %5 : vector<1x64xf32>
    %c0_4 = arith.constant 0 : index
    %c0_5 = arith.constant 0 : index
    %7 = vector.load %arg6[%c0_4, %c0_5] : memref<64x512xf32, #tpu.memory_space<vmem>>, vector<64x512xf32>
    %cst_6 = arith.constant dense<0.000000e+00> : vector<1x512xf32>
    %8 = tpu.matmul %6, %7, %cst_6 {dimension_numbers = #tpu.dot_dimension_numbers<[1], [0], [0], [1], [0, 0, 1, 1], [], []>} : vector<1x64xf32>, vector<64x512xf32>, vector<1x512xf32> -> vector<1x512xf32>
    %cst_7 = arith.constant 9.99999993E-9 : f32
    %9 = vector.broadcast %cst_7 : f32 to vector<1x512xf32>
    %10 = arith.addf %8, %9 : vector<1x512xf32>
    %11 = math.rsqrt %10 : vector<1x512xf32>
    %cst_8 = arith.constant 0.000000e+00 : f32
    %12 = vector.broadcast %cst_8 : f32 to vector<36x512xf32>
    %c0_9 = arith.constant 0 : index
    %c0_10 = arith.constant 0 : index
    %c0_11 = arith.constant 0 : index
    %13 = vector.load %arg2[%c0_9, %c0_10, %c0_11] : memref<1x50x64xf32, #tpu.memory_space<vmem>>, vector<1x36x64xf32>
    %14 = vector.shape_cast %13 : vector<1x36x64xf32> to vector<36x64xf32>
    %15 = vector.broadcast %5 : vector<1x64xf32> to vector<36x64xf32>
    %16 = arith.mulf %14, %15 : vector<36x64xf32>
    %c0_12 = arith.constant 0 : index
    %c0_13 = arith.constant 0 : index
    %c0_14 = arith.constant 0 : index
    %17 = vector.load %arg5[%c0_12, %c0_13, %c0_14] : memref<9x64x512xf32, #tpu.memory_space<vmem>>, vector<1x64x512xf32>
    %18 = vector.shape_cast %17 : vector<1x64x512xf32> to vector<64x512xf32>
    %cst_15 = arith.constant dense<0.000000e+00> : vector<36x512xf32>
    %19 = tpu.matmul %16, %18, %cst_15 {dimension_numbers = #tpu.dot_dimension_numbers<[1], [0], [0], [1], [0, 0, 1, 1], [], []>} : vector<36x64xf32>, vector<64x512xf32>, vector<36x512xf32> -> vector<36x512xf32>
    %20 = arith.addf %12, %19 : vector<36x512xf32>
    %c0_16 = arith.constant 0 : index
    %c1 = arith.constant 1 : index
    %c0_17 = arith.constant 0 : index
    %21 = vector.load %arg2[%c0_16, %c1, %c0_17] : memref<1x50x64xf32, #tpu.memory_space<vmem>>, vector<1x36x64xf32>
    %22 = vector.shape_cast %21 : vector<1x36x64xf32> to vector<36x64xf32>
    %23 = vector.broadcast %5 : vector<1x64xf32> to vector<36x64xf32>
    %24 = arith.mulf %22, %23 : vector<36x64xf32>
    %c1_18 = arith.constant 1 : index
    %c0_19 = arith.constant 0 : index
    %c0_20 = arith.constant 0 : index
    %25 = vector.load %arg5[%c1_18, %c0_19, %c0_20] : memref<9x64x512xf32, #tpu.memory_space<vmem>>, vector<1x64x512xf32>
    %26 = vector.shape_cast %25 : vector<1x64x512xf32> to vector<64x512xf32>
    %cst_21 = arith.constant dense<0.000000e+00> : vector<36x512xf32>
    %27 = tpu.matmul %24, %26, %cst_21 {dimension_numbers = #tpu.dot_dimension_numbers<[1], [0], [0], [1], [0, 0, 1, 1], [], []>} : vector<36x64xf32>, vector<64x512xf32>, vector<36x512xf32> -> vector<36x512xf32>
    %28 = arith.addf %20, %27 : vector<36x512xf32>
    %c0_22 = arith.constant 0 : index
    %c2 = arith.constant 2 : index
    %c0_23 = arith.constant 0 : index
    %29 = vector.load %arg2[%c0_22, %c2, %c0_23] : memref<1x50x64xf32, #tpu.memory_space<vmem>>, vector<1x36x64xf32>
    %30 = vector.shape_cast %29 : vector<1x36x64xf32> to vector<36x64xf32>
    %31 = vector.broadcast %5 : vector<1x64xf32> to vector<36x64xf32>
    %32 = arith.mulf %30, %31 : vector<36x64xf32>
    %c2_24 = arith.constant 2 : index
    %c0_25 = arith.constant 0 : index
    %c0_26 = arith.constant 0 : index
    %33 = vector.load %arg5[%c2_24, %c0_25, %c0_26] : memref<9x64x512xf32, #tpu.memory_space<vmem>>, vector<1x64x512xf32>
    %34 = vector.shape_cast %33 : vector<1x64x512xf32> to vector<64x512xf32>
    %cst_27 = arith.constant dense<0.000000e+00> : vector<36x512xf32>
    %35 = tpu.matmul %32, %34, %cst_27 {dimension_numbers = #tpu.dot_dimension_numbers<[1], [0], [0], [1], [0, 0, 1, 1], [], []>} : vector<36x64xf32>, vector<64x512xf32>, vector<36x512xf32> -> vector<36x512xf32>
    %36 = arith.addf %28, %35 : vector<36x512xf32>
    %c0_28 = arith.constant 0 : index
    %c6 = arith.constant 6 : index
    %c0_29 = arith.constant 0 : index
    %37 = vector.load %arg2[%c0_28, %c6, %c0_29] : memref<1x50x64xf32, #tpu.memory_space<vmem>>, vector<1x36x64xf32>
    %38 = vector.shape_cast %37 : vector<1x36x64xf32> to vector<36x64xf32>
    %39 = vector.broadcast %5 : vector<1x64xf32> to vector<36x64xf32>
    %40 = arith.mulf %38, %39 : vector<36x64xf32>
    %c3 = arith.constant 3 : index
    %c0_30 = arith.constant 0 : index
    %c0_31 = arith.constant 0 : index
    %41 = vector.load %arg5[%c3, %c0_30, %c0_31] : memref<9x64x512xf32, #tpu.memory_space<vmem>>, vector<1x64x512xf32>
    %42 = vector.shape_cast %41 : vector<1x64x512xf32> to vector<64x512xf32>
    %cst_32 = arith.constant dense<0.000000e+00> : vector<36x512xf32>
    %43 = tpu.matmul %40, %42, %cst_32 {dimension_numbers = #tpu.dot_dimension_numbers<[1], [0], [0], [1], [0, 0, 1, 1], [], []>} : vector<36x64xf32>, vector<64x512xf32>, vector<36x512xf32> -> vector<36x512xf32>
    %44 = arith.addf %36, %43 : vector<36x512xf32>
    %c0_33 = arith.constant 0 : index
    %c7 = arith.constant 7 : index
    %c0_34 = arith.constant 0 : index
    %45 = vector.load %arg2[%c0_33, %c7, %c0_34] : memref<1x50x64xf32, #tpu.memory_space<vmem>>, vector<1x36x64xf32>
    %46 = vector.shape_cast %45 : vector<1x36x64xf32> to vector<36x64xf32>
    %47 = vector.broadcast %5 : vector<1x64xf32> to vector<36x64xf32>
    %48 = arith.mulf %46, %47 : vector<36x64xf32>
    %c4 = arith.constant 4 : index
    %c0_35 = arith.constant 0 : index
    %c0_36 = arith.constant 0 : index
    %49 = vector.load %arg5[%c4, %c0_35, %c0_36] : memref<9x64x512xf32, #tpu.memory_space<vmem>>, vector<1x64x512xf32>
    %50 = vector.shape_cast %49 : vector<1x64x512xf32> to vector<64x512xf32>
    %cst_37 = arith.constant dense<0.000000e+00> : vector<36x512xf32>
    %51 = tpu.matmul %48, %50, %cst_37 {dimension_numbers = #tpu.dot_dimension_numbers<[1], [0], [0], [1], [0, 0, 1, 1], [], []>} : vector<36x64xf32>, vector<64x512xf32>, vector<36x512xf32> -> vector<36x512xf32>
    %52 = arith.addf %44, %51 : vector<36x512xf32>
    %c0_38 = arith.constant 0 : index
    %c8 = arith.constant 8 : index
    %c0_39 = arith.constant 0 : index
    %53 = vector.load %arg2[%c0_38, %c8, %c0_39] : memref<1x50x64xf32, #tpu.memory_space<vmem>>, vector<1x36x64xf32>
    %54 = vector.shape_cast %53 : vector<1x36x64xf32> to vector<36x64xf32>
    %55 = vector.broadcast %5 : vector<1x64xf32> to vector<36x64xf32>
    %56 = arith.mulf %54, %55 : vector<36x64xf32>
    %c5 = arith.constant 5 : index
    %c0_40 = arith.constant 0 : index
    %c0_41 = arith.constant 0 : index
    %57 = vector.load %arg5[%c5, %c0_40, %c0_41] : memref<9x64x512xf32, #tpu.memory_space<vmem>>, vector<1x64x512xf32>
    %58 = vector.shape_cast %57 : vector<1x64x512xf32> to vector<64x512xf32>
    %cst_42 = arith.constant dense<0.000000e+00> : vector<36x512xf32>
    %59 = tpu.matmul %56, %58, %cst_42 {dimension_numbers = #tpu.dot_dimension_numbers<[1], [0], [0], [1], [0, 0, 1, 1], [], []>} : vector<36x64xf32>, vector<64x512xf32>, vector<36x512xf32> -> vector<36x512xf32>
    %60 = arith.addf %52, %59 : vector<36x512xf32>
    %c0_43 = arith.constant 0 : index
    %c12 = arith.constant 12 : index
    %c0_44 = arith.constant 0 : index
    %61 = vector.load %arg2[%c0_43, %c12, %c0_44] : memref<1x50x64xf32, #tpu.memory_space<vmem>>, vector<1x36x64xf32>
    %62 = vector.shape_cast %61 : vector<1x36x64xf32> to vector<36x64xf32>
    %63 = vector.broadcast %5 : vector<1x64xf32> to vector<36x64xf32>
    %64 = arith.mulf %62, %63 : vector<36x64xf32>
    %c6_45 = arith.constant 6 : index
    %c0_46 = arith.constant 0 : index
    %c0_47 = arith.constant 0 : index
    %65 = vector.load %arg5[%c6_45, %c0_46, %c0_47] : memref<9x64x512xf32, #tpu.memory_space<vmem>>, vector<1x64x512xf32>
    %66 = vector.shape_cast %65 : vector<1x64x512xf32> to vector<64x512xf32>
    %cst_48 = arith.constant dense<0.000000e+00> : vector<36x512xf32>
    %67 = tpu.matmul %64, %66, %cst_48 {dimension_numbers = #tpu.dot_dimension_numbers<[1], [0], [0], [1], [0, 0, 1, 1], [], []>} : vector<36x64xf32>, vector<64x512xf32>, vector<36x512xf32> -> vector<36x512xf32>
    %68 = arith.addf %60, %67 : vector<36x512xf32>
    %c0_49 = arith.constant 0 : index
    %c13 = arith.constant 13 : index
    %c0_50 = arith.constant 0 : index
    %69 = vector.load %arg2[%c0_49, %c13, %c0_50] : memref<1x50x64xf32, #tpu.memory_space<vmem>>, vector<1x36x64xf32>
    %70 = vector.shape_cast %69 : vector<1x36x64xf32> to vector<36x64xf32>
    %71 = vector.broadcast %5 : vector<1x64xf32> to vector<36x64xf32>
    %72 = arith.mulf %70, %71 : vector<36x64xf32>
    %c7_51 = arith.constant 7 : index
    %c0_52 = arith.constant 0 : index
    %c0_53 = arith.constant 0 : index
    %73 = vector.load %arg5[%c7_51, %c0_52, %c0_53] : memref<9x64x512xf32, #tpu.memory_space<vmem>>, vector<1x64x512xf32>
    %74 = vector.shape_cast %73 : vector<1x64x512xf32> to vector<64x512xf32>
    %cst_54 = arith.constant dense<0.000000e+00> : vector<36x512xf32>
    %75 = tpu.matmul %72, %74, %cst_54 {dimension_numbers = #tpu.dot_dimension_numbers<[1], [0], [0], [1], [0, 0, 1, 1], [], []>} : vector<36x64xf32>, vector<64x512xf32>, vector<36x512xf32> -> vector<36x512xf32>
    %76 = arith.addf %68, %75 : vector<36x512xf32>
    %c0_55 = arith.constant 0 : index
    %c14 = arith.constant 14 : index
    %c0_56 = arith.constant 0 : index
    %77 = vector.load %arg2[%c0_55, %c14, %c0_56] : memref<1x50x64xf32, #tpu.memory_space<vmem>>, vector<1x36x64xf32>
    %78 = vector.shape_cast %77 : vector<1x36x64xf32> to vector<36x64xf32>
    %79 = vector.broadcast %5 : vector<1x64xf32> to vector<36x64xf32>
    %80 = arith.mulf %78, %79 : vector<36x64xf32>
    %c8_57 = arith.constant 8 : index
    %c0_58 = arith.constant 0 : index
    %c0_59 = arith.constant 0 : index
    %81 = vector.load %arg5[%c8_57, %c0_58, %c0_59] : memref<9x64x512xf32, #tpu.memory_space<vmem>>, vector<1x64x512xf32>
    %82 = vector.shape_cast %81 : vector<1x64x512xf32> to vector<64x512xf32>
    %cst_60 = arith.constant dense<0.000000e+00> : vector<36x512xf32>
    %83 = tpu.matmul %80, %82, %cst_60 {dimension_numbers = #tpu.dot_dimension_numbers<[1], [0], [0], [1], [0, 0, 1, 1], [], []>} : vector<36x64xf32>, vector<64x512xf32>, vector<36x512xf32> -> vector<36x512xf32>
    %84 = arith.addf %76, %83 : vector<36x512xf32>
    %85 = vector.broadcast %11 : vector<1x512xf32> to vector<36x512xf32>
    %86 = arith.mulf %84, %85 : vector<36x512xf32>
    %c0_61 = arith.constant 0 : index
    %87 = memref.load %arg8[%c0_61] : memref<1xf32, #tpu.memory_space<smem>>
    %c0_62 = arith.constant 0 : index
    %c0_63 = arith.constant 0 : index
    %c0_64 = arith.constant 0 : index
    %88 = vector.load %arg7[%c0_62, %c0_63, %c0_64] : memref<1x36x1xf32, #tpu.memory_space<vmem>>, vector<1x36x1xf32>
    %89 = vector.shape_cast %88 : vector<1x36x1xf32> to vector<36x1xf32>
    %90 = vector.broadcast %87 : f32 to vector<36x1xf32>
    %91 = arith.mulf %90, %89 : vector<36x1xf32>
    %92 = vector.broadcast %91 : vector<36x1xf32> to vector<36x512xf32>
    %93 = arith.addf %86, %92 : vector<36x512xf32>
    %cst_65 = arith.constant 0.000000e+00 : f32
    %94 = vector.broadcast %cst_65 : f32 to vector<36x512xf32>
    %95 = arith.cmpf oge, %93, %94 : vector<36x512xf32>
    %cst_66 = arith.constant 2.000000e-01 : f32
    %96 = vector.broadcast %cst_66 : f32 to vector<36x512xf32>
    %97 = arith.mulf %96, %93 : vector<36x512xf32>
    %98 = arith.select %95, %93, %97 : vector<36x512xi1>, vector<36x512xf32>
    %c0_67 = arith.constant 0 : index
    %c0_68 = arith.constant 0 : index
    %c0_69 = arith.constant 0 : index
    %99 = vector.load %arg9[%c0_67, %c0_68, %c0_69] : memref<1x36x512xf32, #tpu.memory_space<vmem>>, vector<1x36x512xf32>
    %100 = vector.shape_cast %99 : vector<1x36x512xf32> to vector<36x512xf32>
    %101 = vector.shape_cast %98 : vector<36x512xf32> to vector<1x36x512xf32>
    tpu.vector_store %arg9[%c0_67, %c0_68, %c0_69], %101 {strides = array<i32>} : memref<1x36x512xf32, #tpu.memory_space<vmem>>, vector<1x36x512xf32>,
    return
  }
  func.func @transform_0(%arg0: i32) -> (i32, i32) {
    %c0_i32 = arith.constant 0 : i32
    %c0_i32_0 = arith.constant 0 : i32
    %c0_i32_1 = arith.constant 0 : i32
    return %c0_i32, %c0_i32_0 : i32, i32
  }
  func.func @transform_1(%arg0: i32) -> (i32, i32, i32) {
    %c0_i32 = arith.constant 0 : i32
    %c0_i32_0 = arith.constant 0 : i32
    %c0_i32_1 = arith.constant 0 : i32
    return %arg0, %c0_i32, %c0_i32_0 : i32, i32, i32
  }
  func.func @transform_2(%arg0: i32) -> (i32, i32) {
    %c0_i32 = arith.constant 0 : i32
    %c0_i32_0 = arith.constant 0 : i32
    %c0_i32_1 = arith.constant 0 : i32
    return %c0_i32, %c0_i32_0 : i32, i32
  }
  func.func @transform_3(%arg0: i32) -> (i32, i32) {
    %c0_i32 = arith.constant 0 : i32
    %c0_i32_0 = arith.constant 0 : i32
    %c0_i32_1 = arith.constant 0 : i32
    return %c0_i32, %c0_i32_0 : i32, i32
  }
  func.func @transform_4(%arg0: i32) -> (i32, i32, i32) {
    %c0_i32 = arith.constant 0 : i32
    %c0_i32_0 = arith.constant 0 : i32
    %c0_i32_1 = arith.constant 0 : i32
    %c0_i32_2 = arith.constant 0 : i32
    return %c0_i32, %c0_i32_0, %c0_i32_1 : i32, i32, i32
  }
  func.func @transform_5(%arg0: i32) -> (i32, i32) {
    %c0_i32 = arith.constant 0 : i32
    %c0_i32_0 = arith.constant 0 : i32
    %c0_i32_1 = arith.constant 0 : i32
    return %c0_i32, %c0_i32_0 : i32, i32
  }
  func.func @transform_6(%arg0: i32) -> (i32, i32, i32) {
    %c0_i32 = arith.constant 0 : i32
    %c0_i32_0 = arith.constant 0 : i32
    %c0_i32_1 = arith.constant 0 : i32
    return %arg0, %c0_i32, %c0_i32_0 : i32, i32, i32
  }
  func.func @transform_7(%arg0: i32) -> i32 {
    %c0_i32 = arith.constant 0 : i32
    %c0_i32_0 = arith.constant 0 : i32
    return %c0_i32 : i32
  }
  func.func @transform_8(%arg0: i32) -> (i32, i32, i32) {
    %c0_i32 = arith.constant 0 : i32
    %c0_i32_0 = arith.constant 0 : i32
    %c0_i32_1 = arith.constant 0 : i32
    return %arg0, %c0_i32, %c0_i32_0 : i32, i32, i32
  }
}

</mosaic_0001>

<bundles_post_ra>
// kernel: tpu_custom_call.1
= control target key start
LH: loop header
LB: loop body
LE: loop exit
PB: predicated region body
PF: predicated region fallthrough
CT: control target
= control target key end

     0   :  { %s4299_s0 = inlined_call_operand.hbm [shape: f32[2,32], index: 0, kind: input, shape index: {}]   ;;  %s4300_s1 = inlined_call_operand.vmem [shape: f32[2,50,64], index: 1, kind: input, shape index: {}]   ;;  %s4301_s2 = inlined_call_operand.hbm [shape: f32[32,64], index: 2, kind: input, shape index: {}]   ;;  %s4302_s3 = inlined_call_operand.hbm [shape: f32[1,64], index: 3, kind: input, shape index: {}]   ;;  %s4303_s4 = inlined_call_operand.hbm [shape: f32[9,64,512], index: 4, kind: input, shape index: {}]   ;;  %s4304_s5 = inlined_call_operand.hbm [shape: f32[64,512], index: 5, kind: input, shape index: {}]   ;;  %s4305_s6 = inlined_call_operand.vmem [shape: f32[2,36,1], index: 6, kind: input, shape index: {}]   ;;  %s4306_s7 = inlined_call_operand.<no memory space> [shape: f32[1], index: 7, kind: input, shape index: {}]   ;;  %s4307_s8 = inlined_call_operand.vmem [shape: f32[2,36,512], index: 8, kind: output, shape index: {}]  }
   0x1   :  { %13 = sst [smem:[#allocation2]] %s4306_s7 }
   0x2   :  { %14 = vsyncpa [#allocation4], 0 }
   0x3   :  { %15 = vsyncpa [#allocation6], 0 }
   0x4   :  { %16 = vsyncpa [#allocation9], 0  ;;  %s3202_s29 = smov 0  }
   0x5 LB: > { %s254_s10 = sshll.u32 %s4301_s2, 4  ;;  %s3211_s11 = sadd.s32 4294967295, %s3142_s29   ;;  %s3142_s29 = sphi %s3202_s29, %s22_s29   ;;  %s255_s10 = int_to_ptr.hbm [resolvable:$true] %s254_s10 }
   0x6   : > { %p2689_p0 = scmp.ge.s32.totalorder %s3142_s29, 1  ;;  %p231_p1 = scmp.lt.s32.totalorder %s3142_s29, 3 }
   0x7   : > { %p2935_p2 = scmp.eq.s32.totalorder %s3211_s11, 0  ;;  %s3144_s12 = smov [#allocation5]  }
   0x8   : > { %p3216_p3 = pnand %p2689_p0, %p231_p1  ;;  %s256_s13 = sshll.u32 %s3144_s12, 4  ;;  %s257_s13 = int_to_ptr.vmem [resolvable:$true] %s256_s13 }
   0x9   : > { %s280_s16 = sshll.u32 %s4303_s4, 4  ;;  %s3145_s18 = smov [#allocation8]   ;;  %s281_s16 = int_to_ptr.hbm [resolvable:$true] %s280_s16 }
   0xa   : > { %p2919_p4 = pneg %p3216_p3  ;;  %s282_s19 = sshll.u32 %s3145_s18, 4  ;;  %s283_s19 = int_to_ptr.vmem [resolvable:$true] %s282_s19 }
   0xb   : > { %s3146_s20 = smov 128   ;;  %s3147_s21 = smov 8  }
   0xc   : > { %p3227_p5 = pnand %p2935_p2, %p2919_p4  ;;  %s243_s24 = sshll.u32 %s4299_s0, 4  ;;  %s244_s24 = int_to_ptr.hbm [resolvable:$true] %s243_s24 }
   0xd   : > { %s3148_s25 = smov 512   ;;  %s3149_s26 = smov 32  }
   0xe   : > { %2925 = dma.hbm_to_vmem [thread:$0]  (!%p3227_p5), %s255_s10, 512, %s257_s13, [#allocation6], %s3146_s20, %s3146_s20, %s3147_s21  }
   0xf   : > { %2931 = dma.hbm_to_vmem [thread:$0]  (!%p3227_p5), %s281_s16, 36864, %s283_s19, [#allocation9], %s3148_s25, %s3148_s25, %s3149_s26  }
  0x10   : > { %s3150_s27 = smov [#allocation3]   ;;  %s269_s12 = sshll.u32 %s4302_s3, 4  ;;  %s270_s12 = int_to_ptr.hbm [resolvable:$true] %s269_s12 }
  0x11   : > { %s245_s28 = sshll.u32 %s3150_s27, 4  ;;  %s294_s14 = sshll.u32 %s4304_s5, 4  ;;  %s246_s28 = int_to_ptr.vmem [resolvable:$true] %s245_s28  ;;  %s295_s14 = int_to_ptr.hbm [resolvable:$true] %s294_s14 }
  0x12   : > { %2922 = dma.hbm_to_vmem [thread:$0]  (!%p3227_p5), %s244_s24, 32, %s246_s28, [#allocation4]  }
  0x13   : > { %s3151_s15 = smov [#allocation7]   ;;  %s3152_s16 = smov [#allocation10]  }
  0x14   : > { %s271_s18 = sshll.u32 %s3151_s15, 4  ;;  %s296_s19 = sshll.u32 %s3152_s16, 4  ;;  %s272_s18 = int_to_ptr.vmem [resolvable:$true] %s271_s18  ;;  %s297_s19 = int_to_ptr.vmem [resolvable:$true] %s296_s19 }
  0x15   : > { %2928 = dma.hbm_to_vmem [thread:$0]  (!%p3227_p5), %s270_s12, 16, %s272_s18, [#allocation6]  }
  0x16   : > { %2934 = dma.hbm_to_vmem [thread:$0]  (!%p3227_p5), %s295_s14, 4096, %s297_s19, [#allocation9], %s3148_s25, %s3148_s25, %s3149_s26  }
  0x17   : > { %331 = sbr.rel (%p3216_p3) target bundleno = 674 (0x2a2), region = 52 }
  0x1c   : > { %3129 = dma.done.wait (%p2935_p2), [#allocation4], 32  }
  0x1d   : > { %3131 = vsyncadd (%p2935_p2), [#allocation4], 4294967264 }
  0x1e   : > { %3133 = dma.done.wait (%p2935_p2), [#allocation6], 528  }
  0x1f   : > { %3135 = vsyncadd (%p2935_p2), [#allocation6], 4294966768 }
  0x20   : > { %3137 = dma.done.wait (%p2935_p2), [#allocation9], 40960  }
  0x21   : > { %3139 = vsyncadd (%p2935_p2), [#allocation9], 4294926336  ;;  %v411_v0 = vld [vmem:[#allocation5 + $0x18] sm:$0xff]  ;;  %v410_v1 = vld [vmem:[#allocation5 + $0x10] sm:$0xff]  ;;  %s2893_s7 = scalar_lea.vmem [#allocation3], %s3142_s29  ;;  %vm413_vm0 = vcmask 261120  }
  0x22   : > { %429 = vmatpush.msra.mxu0 %v411_v0  ;;  %v466_v2 = vld [vmem:[#allocation10 + $0xe0] sm:$0xff]  ;;  %v467_v4 = vld [vmem:[#allocation10 + $0xe8] sm:$0xff]  ;;  %v468_v5 = vld [vmem:[#allocation10 + $0xf0] sm:$0xff]  ;;  %p391_p6 = scmp.lt.s32.totalorder %s3211_s11, 1  ;;  %vm470_vm1 = vcmask 523264   ;;  %s2432_s23 = sld [smem:[#allocation2]] }
  0x23   : > { %v409_v3 = vld [vmem:[#allocation5 + $0x8] sm:$0xff]  ;;  %482 = vmatpush.msra.mxu1 %v466_v2  ;;  %502 = vmatpush.msra.mxu2 %v467_v4  ;;  %v464_v8 = vld [vmem:[#allocation10 + $0xd0] sm:$0xff]  ;;  %v408_v9 = vld [vmem:[#allocation5] sm:$0xff] }
  0x24   : > { %430 = vmatpush.msra.mxu0 %v410_v1  ;;  %v462_v6 = vld [vmem:[#allocation10 + $0xc0] sm:$0xff]  ;;  %v463_v7 = vld [vmem:[#allocation10 + $0xc8] sm:$0xff]  ;;  %522 = vmatpush.msra.mxu3 %v468_v5  ;;  %v2895_v12 = vld [vmem:[%s2893_s7 - $0x1] sm:$0x1]  ;;  %s4346_s11 = smov (!%p391_p6, %s3211_s11), 1 }
  0x25   : > { %483 = vmatpush.msra.mxu1 %v462_v6  ;;  %v458_v10 = vld [vmem:[#allocation10 + $0xa0] sm:$0xff]  ;;  %v459_v11 = vld [vmem:[#allocation10 + $0xa8] sm:$0xff]  ;;  %503 = vmatpush.msra.mxu2 %v463_v7  ;;  %v460_v13 = vld [vmem:[#allocation10 + $0xb0] sm:$0xff]  ;;  %s2896_s17 = smul.u32 56, %s4346_s11 }
  0x26   : > { %431 = vmatpush.msra.mxu0 %v409_v3  ;;  %v469_v14 = vld [vmem:[#allocation10 + $0xf8] sm:$0xff]  ;;  %523 = vmatpush.msra.mxu3 %v464_v8  ;;  %v454_v15 = vld [vmem:[#allocation10 + $0x80] sm:$0xff]  ;;  %v455_v16 = vld [vmem:[#allocation10 + $0x88] sm:$0xff]  ;;  %s2897_s24 = smul.u32 40, %s4346_s11 }
  0x27   : > { %484 = vmatpush.msra.mxu1 %v458_v10  ;;  %504 = vmatpush.msra.mxu2 %v459_v11  ;;  %v456_v17 = vld [vmem:[#allocation10 + $0x90] sm:$0xff]  ;;  %v465_v18 = vld [vmem:[#allocation10 + $0xd8] sm:$0xff]  ;;  %v450_v19 = vld [vmem:[#allocation10 + $0x60] sm:$0xff]  ;;  %s3273_s22 = scalar_lea.vmem %s4300_s1, %s2896_s17  ;;  %s2898_s28 = smul.u32 160, %s4346_s11 }
  0x28   : > { %432 = vmatpush.msra.mxu0 %v408_v9  ;;  %524 = vmatpush.msra.mxu3 %v460_v13  ;;  %v451_v20 = vld [vmem:[#allocation10 + $0x68] sm:$0xff]  ;;  %v452_v21 = vld [vmem:[#allocation10 + $0x70] sm:$0xff]  ;;  %v461_v22 = vld [vmem:[#allocation10 + $0xb8] sm:$0xff]  ;;  %s3963_s27 = scalar_lea.vmem %s4305_s6, %s2897_s24 }
  0x29   : > { %2706 = vmatmul.msk.f32.vlgmr.msra.gmra.mxu0 %vm413_vm0, %v2895_v12  ;;  %485 = vmatpush.msra.mxu1 %v454_v15  ;;  %v446_v23 = vld [vmem:[#allocation10 + $0x40] sm:$0xff]  ;;  %v447_v24 = vld [vmem:[#allocation10 + $0x48] sm:$0xff]  ;;  %v448_v25 = vld [vmem:[#allocation10 + $0x50] sm:$0xff]  ;;  %s4226_s9 = scalar_lea.vmem %s4307_s8, %s2898_s28 }
  0x2a   : > { %542 = vmatpush.msrb.mxu0 %v469_v14  ;;  %505 = vmatpush.msra.mxu2 %v455_v16  ;;  %v457_v26 = vld [vmem:[#allocation10 + $0x98] sm:$0xff]  ;;  %v442_v27 = vld [vmem:[#allocation10 + $0x20] sm:$0xff]  ;;  %v443_v28 = vld [vmem:[#allocation10 + $0x28] sm:$0xff] }
  0x2b   : > { %525 = vmatpush.msra.mxu3 %v456_v17  ;;  %486 = vmatpush.msra.mxu1 %v450_v19  ;;  %v444_v29 = vld [vmem:[#allocation10 + $0x30] sm:$0xff]  ;;  %v453_v30 = vld [vmem:[#allocation10 + $0x78] sm:$0xff]  ;;  %v438_v31 = vld [vmem:[#allocation10] sm:$0xff] }
  0x2c   : > { %543 = vmatpush.msrb.mxu0 %v465_v18  ;;  %506 = vmatpush.msra.mxu2 %v451_v20  ;;  %v439_v32 = vld [vmem:[#allocation10 + $0x8] sm:$0xff]  ;;  %v440_v33 = vld [vmem:[#allocation10 + $0x10] sm:$0xff]  ;;  %v449_v34 = vld [vmem:[#allocation10 + $0x58] sm:$0xff] }
  0x2d   : > { %526 = vmatpush.msra.mxu3 %v452_v21  ;;  %487 = vmatpush.msra.mxu1 %v446_v23  ;;  %v676_v35 = vld [vmem:[#allocation8 + $0x1e0] sm:$0xff]  ;;  %v677_v36 = vld [vmem:[#allocation8 + $0x1e8] sm:$0xff]  ;;  %v678_v37 = vld [vmem:[#allocation8 + $0x1f0] sm:$0xff] }
  0x2e   : > { %544 = vmatpush.msrb.mxu0 %v461_v22  ;;  %507 = vmatpush.msra.mxu2 %v447_v24  ;;  %v445_v38 = vld [vmem:[#allocation10 + $0x38] sm:$0xff]  ;;  %v672_v41 = vld [vmem:[#allocation8 + $0x1c0] sm:$0xff]  ;;  %v673_v42 = vld [vmem:[#allocation8 + $0x1c8] sm:$0xff] }
  0x2f   : > { %527 = vmatpush.msra.mxu3 %v448_v25  ;;  %488 = vmatpush.msra.mxu1 %v442_v27  ;;  %v441_v39 = vld [vmem:[#allocation10 + $0x18] sm:$0xff]  ;;  %v674_v43 = vld [vmem:[#allocation8 + $0x1d0] sm:$0xff]  ;;  %v668_v45 = vld [vmem:[#allocation8 + $0x1a0] sm:$0xff] }
  0x30   : > { %545 = vmatpush.msrb.mxu0 %v457_v26  ;;  %508 = vmatpush.msra.mxu2 %v443_v28  ;;  %v679_v40 = vld [vmem:[#allocation8 + $0x1f8] sm:$0xff]  ;;  %v669_v46 = vld [vmem:[#allocation8 + $0x1a8] sm:$0xff]  ;;  %v670_v47 = vld [vmem:[#allocation8 + $0x1b0] sm:$0xff] }
  0x31   : > { %528 = vmatpush.msra.mxu3 %v444_v29  ;;  %489 = vmatpush.msra.mxu1 %v438_v31  ;;  %v675_v44 = vld [vmem:[#allocation8 + $0x1d8] sm:$0xff]  ;;  %v664_v49 = vld [vmem:[#allocation8 + $0x180] sm:$0xff]  ;;  %v665_v50 = vld [vmem:[#allocation8 + $0x188] sm:$0xff] }
  0x32   : > { %546 = vmatpush.msrb.mxu0 %v453_v30  ;;  %509 = vmatpush.msra.mxu2 %v439_v32  ;;  %v671_v48 = vld [vmem:[#allocation8 + $0x1b8] sm:$0xff]  ;;  %v666_v51 = vld [vmem:[#allocation8 + $0x190] sm:$0xff]  ;;  %v660_v53 = vld [vmem:[#allocation8 + $0x160] sm:$0xff] }
  0x33   : > { %529 = vmatpush.msra.mxu3 %v440_v33  ;;  %703 = vmatpush.msrb.mxu1 %v676_v35  ;;  %v667_v52 = vld [vmem:[#allocation8 + $0x198] sm:$0xff]  ;;  %v661_v54 = vld [vmem:[#allocation8 + $0x168] sm:$0xff]  ;;  %v662_v55 = vld [vmem:[#allocation8 + $0x170] sm:$0xff] }
  0x34   : > { %547 = vmatpush.msrb.mxu0 %v449_v34  ;;  %735 = vmatpush.msrb.mxu2 %v677_v36  ;;  %v663_v56 = vld [vmem:[#allocation8 + $0x178] sm:$0xff]  ;;  %v656_v57 = vld [vmem:[#allocation8 + $0x140] sm:$0xff]  ;;  %v657_v58 = vld [vmem:[#allocation8 + $0x148] sm:$0xff] }
  0x35   : > { %767 = vmatpush.msrb.mxu3 %v678_v37  ;;  %704 = vmatpush.msrb.mxu1 %v672_v41  ;;  %v658_v59 = vld [vmem:[#allocation8 + $0x150] sm:$0xff]  ;;  %v659_v60 = vld [vmem:[#allocation8 + $0x158] sm:$0xff]  ;;  %v652_v61 = vld [vmem:[#allocation8 + $0x120] sm:$0xff] }
  0x36   : > { %548 = vmatpush.msrb.mxu0 %v445_v38  ;;  %736 = vmatpush.msrb.mxu2 %v673_v42  ;;  %v653_v62 = vld [vmem:[#allocation8 + $0x128] sm:$0xff]  ;;  %v654_v63 = vld [vmem:[#allocation8 + $0x130] sm:$0xff]  ;;  %v655_v0 = vld [vmem:[#allocation8 + $0x138] sm:$0xff] }
  0x37   : > { %768 = vmatpush.msrb.mxu3 %v674_v43  ;;  %705 = vmatpush.msrb.mxu1 %v668_v45  ;;  %v648_v1 = vld [vmem:[#allocation8 + $0x100] sm:$0xff]  ;;  %v649_v2 = vld [vmem:[#allocation8 + $0x108] sm:$0xff]  ;;  %v650_v3 = vld [vmem:[#allocation8 + $0x110] sm:$0xff] }
  0x38   : > { %549 = vmatpush.msrb.mxu0 %v441_v39  ;;  %737 = vmatpush.msrb.mxu2 %v669_v46  ;;  %v651_v4 = vld [vmem:[#allocation8 + $0x118] sm:$0xff]  ;;  %v634_v9 = vld [vmem:[#allocation8 + $0xe8] sm:$0xff]  ;;  %v635_v10 = vld [vmem:[#allocation8 + $0xf0] sm:$0xff] }
  0x39   : > { %769 = vmatpush.msrb.mxu3 %v670_v47  ;;  %706 = vmatpush.msrb.mxu1 %v664_v49  ;;  %v412_v5 = vld [vmem:[#allocation7] sm:$0x1]  ;;  %v638_v11 = vld [vmem:[%s3273_s22 + $0x9] sm:$0xff]  ;;  %v597_v12 = vld [vmem:[%s3273_s22 + $0x18] sm:$0xff] }
  0x3a   : > { %799 = vmatpush.msra.mxu0 %v679_v40  ;;  %738 = vmatpush.msrb.mxu2 %v665_v50  ;;  %v637_v8 = vld [vmem:[%s3273_s22 + $0x1] sm:$0xff]  ;;  %v967_v19 = vld [vmem:[%s3273_s22 + $0xa] sm:$0xff]  ;;  %v631_v21 = vld [vmem:[#allocation8 + $0xd0] sm:$0xff] }
  0x3b   : > { %770 = vmatpush.msrb.mxu3 %v666_v51  ;;  %707 = vmatpush.msrb.mxu1 %v660_v53  ;;  %v633_v15 = vld [vmem:[#allocation8 + $0xe0] sm:$0xff]  ;;  %v636_v16 = vld [vmem:[#allocation8 + $0xf8] sm:$0xff]  ;;  %v630_v20 = vld [vmem:[#allocation8 + $0xc8] sm:$0xff] }
  0x3c   : > { %800 = vmatpush.msra.mxu0 %v675_v44  ;;  %739 = vmatpush.msrb.mxu2 %v661_v54  ;;  %v598_v17 = vld [vmem:[%s3273_s22 + $0x20] sm:$0xf]  ;;  %v968_v22 = vld [vmem:[%s3273_s22 + $0x12] sm:$0xff]  ;;  %v1172_v25 = vld [vmem:[%s3273_s22 + $0x6] sm:$0xff] }
  0x3d   : > { %771 = vmatpush.msrb.mxu3 %v662_v55  ;;  %708 = vmatpush.msrb.mxu1 %v656_v57  ;;  %v966_v18 = vld [vmem:[%s3273_s22 + $0x2] sm:$0xff]  ;;  %v969_v23 = vld [vmem:[%s3273_s22 + $0x1a] sm:$0xff]  ;;  %v1173_v26 = vld [vmem:[%s3273_s22 + $0xe] sm:$0xff] }
  0x3e   : > { %801 = vmatpush.msra.mxu0 %v671_v48  ;;  %740 = vmatpush.msrb.mxu2 %v657_v58  ;;  %v970_v24 = vld [vmem:[%s3273_s22 + $0x22] sm:$0xf]  ;;  %v1174_v27 = vld [vmem:[%s3273_s22 + $0x16] sm:$0xff]  ;;  %v1176_v29 = vld [vmem:[%s3273_s22 + $0x26] sm:$0xf] }
  0x3f   : > { %772 = vmatpush.msrb.mxu3 %v658_v59  ;;  %709 = vmatpush.msrb.mxu1 %v652_v61  ;;  %v1175_v28 = vld [vmem:[%s3273_s22 + $0x1e] sm:$0xff]  ;;  %v1378_v30 = vld [vmem:[%s3273_s22 + $0x7] sm:$0xff]  ;;  %v1379_v36 = vld [vmem:[%s3273_s22 + $0xf] sm:$0xff] }
  0x40   : > { %802 = vmatpush.msra.mxu0 %v667_v52  ;;  %741 = vmatpush.msrb.mxu2 %v653_v62  ;;  %v629_v33 = vld [vmem:[#allocation8 + $0xc0] sm:$0xff]  ;;  %v632_v34 = vld [vmem:[#allocation8 + $0xd8] sm:$0xff]  ;;  %v626_v39 = vld [vmem:[#allocation8 + $0xa8] sm:$0xff] }
  0x41   : > { %773 = vmatpush.msrb.mxu3 %v654_v63  ;;  %710 = vmatpush.msrb.mxu1 %v648_v1  ;;  %v1380_v37 = vld [vmem:[%s3273_s22 + $0x17] sm:$0xff]  ;;  %v1381_v38 = vld [vmem:[%s3273_s22 + $0x1f] sm:$0xff]  ;;  %v595_v41 = vld [vmem:[%s3273_s22 + $0x8] sm:$0xff] }
  0x42   : > { %803 = vmatpush.msra.mxu0 %v663_v56  ;;  %742 = vmatpush.msrb.mxu2 %v649_v2  ;;  %v627_v40 = vld [vmem:[#allocation8 + $0xb0] sm:$0xff]  ;;  %v1382_v46 = vld [vmem:[%s3273_s22 + $0x27] sm:$0xf]  ;;  %v628_v48 = vld [vmem:[#allocation8 + $0xb8] sm:$0xff] }
  0x43   : > { %774 = vmatpush.msrb.mxu3 %v650_v3  ;;  %v596_v42 = vld [vmem:[%s3273_s22 + $0x10] sm:$0xff]  ;;  %v625_v47 = vld [vmem:[#allocation8 + $0xa0] sm:$0xff]  ;;  %v1792_v61 = vld [vmem:[%s3273_s22 + $0x1c] sm:$0xff] }
  0x44   : > { %804 = vmatpush.msra.mxu0 %v659_v60  ;;  %v1587_v52 = vld [vmem:[%s3273_s22 + $0x20] sm:$0xff]  ;;  %v1588_v53 = vld [vmem:[%s3273_s22 + $0x28] sm:$0xf]  ;;  %v622_v54 = vld [vmem:[#allocation8 + $0x88] sm:$0xff] }
  0x45   : > { %v623_v55 = vld [vmem:[#allocation8 + $0x90] sm:$0xff]  ;;  %v1790_v59 = vld [vmem:[%s3273_s22 + $0xc] sm:$0xff]  ;;  %v1793_v1 = vld [vmem:[%s3273_s22 + $0x24] sm:$0xff] }
  0x46   : > { %805 = vmatpush.msra.mxu0 %v655_v0  ;;  %v1791_v60 = vld [vmem:[%s3273_s22 + $0x14] sm:$0xff]  ;;  %v1794_v2 = vld [vmem:[%s3273_s22 + $0x2c] sm:$0xf] }
  0x47   : > { %v1996_v3 = vld [vmem:[%s3273_s22 + $0xd] sm:$0xff] }
  0x48   : > { %806 = vmatpush.msra.mxu0 %v651_v4 }
  0xa6   : > { %v434_v6 = vpop.f32.mrf.mxu0 }
  0xa7   : > { %v435_v7 = vadd.f32 %v434_v6, %v412_v5 }
  0xa9   : > { %v437_v13 = vmul.f32 %v435_v7, %v435_v7  ;;  %v3278_v14 = vperm.slane %v435_v7, 0  ;;  %v1997_v7 = vld [vmem:[%s3273_s22 + $0x15] sm:$0xff] }
  0xab   : > { %2707 = vmatmul.msk.f32.vlgmr.msra.gmra.mxu1 %vm470_vm1, %v437_v13  ;;  %2708 = vmatmul.msk.f32.vlgmr.msra.gmra.mxu2 %vm470_vm1, %v437_v13  ;;  %v3297_v31 = vmul.f32 %v637_v8, %v3278_v14  ;;  %v3300_v32 = vmul.f32 %v638_v11, %v3278_v14  ;;  %v3303_v35 = vmul.f32 %v3278_v14, %v597_v12  ;;  %v1998_v8 = vld [vmem:[%s3273_s22 + $0x1d] sm:$0xff] }
  0xac   : > { %2709 = vmatmul.msk.f32.vlgmr.msra.gmra.mxu3 %vm470_vm1, %v437_v13  ;;  %2710 = vmatmul.msk.f32.vlgmr.msrb.gmra.mxu0 %vm470_vm1, %v437_v13  ;;  %v3311_v43 = vmul.f32 %v3278_v14, %v598_v17  ;;  %v3314_v44 = vmul.f32 %v966_v18, %v3278_v14  ;;  %v3317_v45 = vmul.f32 %v967_v19, %v3278_v14  ;;  %v624_v11 = vld [vmem:[#allocation8 + $0x98] sm:$0xff]  ;;  %v2202_v17 = vld [vmem:[%s3273_s22 + $0xe] sm:$0xff] }
  0xad   : > { %878 = vmatpush.msra.mxu2 %v634_v9  ;;  %910 = vmatpush.msra.mxu3 %v635_v10  ;;  %v3321_v49 = vmul.f32 %v968_v22, %v3278_v14  ;;  %v3324_v50 = vmul.f32 %v969_v23, %v3278_v14  ;;  %v3327_v51 = vmul.f32 %v970_v24, %v3278_v14  ;;  %v1999_v9 = vld [vmem:[%s3273_s22 + $0x25] sm:$0xff]  ;;  %v2203_v18 = vld [vmem:[%s3273_s22 + $0x16] sm:$0xff] }
  0xae   : > { %846 = vmatpush.msra.mxu1 %v633_v15  ;;  %942 = vmatpush.msrb.mxu0 %v636_v16  ;;  %v3332_v56 = vmul.f32 %v1172_v25, %v3278_v14  ;;  %v3335_v57 = vmul.f32 %v1173_v26, %v3278_v14  ;;  %v3338_v58 = vmul.f32 %v1174_v27, %v3278_v14  ;;  %v621_v10 = vld [vmem:[#allocation8 + $0x80] sm:$0xff]  ;;  %v2000_v16 = vld [vmem:[%s3273_s22 + $0x2d] sm:$0xf]  ;;  %v620_v25 = vld [vmem:[#allocation8 + $0x78] sm:$0xff] }
  0xaf   : > { %879 = vmatpush.msra.mxu2 %v630_v20  ;;  %911 = vmatpush.msra.mxu3 %v631_v21  ;;  %v3344_v62 = vmul.f32 %v1175_v28, %v3278_v14  ;;  %v3347_v63 = vmul.f32 %v1176_v29, %v3278_v14  ;;  %v3350_v0 = vmul.f32 %v1378_v30, %v3278_v14  ;;  %v618_v19 = vld [vmem:[#allocation8 + $0x68] sm:$0xff]  ;;  %v619_v20 = vld [vmem:[#allocation8 + $0x70] sm:$0xff]  ;;  %v2204_v23 = vld [vmem:[%s3273_s22 + $0x1e] sm:$0xff] }
  0xb0   : > { %847 = vmatpush.msra.mxu1 %v629_v33  ;;  %943 = vmatpush.msrb.mxu0 %v632_v34  ;;  %v3356_v4 = vmul.f32 %v1379_v36, %v3278_v14  ;;  %v3359_v5 = vmul.f32 %v1380_v37, %v3278_v14  ;;  %v3362_v6 = vmul.f32 %v1381_v38, %v3278_v14  ;;  %v617_v24 = vld [vmem:[#allocation8 + $0x60] sm:$0xff]  ;;  %v614_v30 = vld [vmem:[#allocation8 + $0x48] sm:$0xff] }
  0xb1   : > { %880 = vmatpush.msra.mxu2 %v626_v39  ;;  %912 = vmatpush.msra.mxu3 %v627_v40  ;;  %v3372_v12 = vmul.f32 %v1382_v46, %v3278_v14  ;;  %v3375_v13 = vmul.f32 %v3278_v14, %v595_v41  ;;  %v3378_v15 = vmul.f32 %v3278_v14, %v596_v42  ;;  %v2205_v29 = vld [vmem:[%s3273_s22 + $0x26] sm:$0xff]  ;;  %v2206_v37 = vld [vmem:[%s3273_s22 + $0x2e] sm:$0xf]  ;;  %v616_v39 = vld [vmem:[#allocation8 + $0x58] sm:$0xff] }
  0xb2   : > { %848 = vmatpush.msra.mxu1 %v625_v47  ;;  %944 = vmatpush.msrb.mxu0 %v628_v48  ;;  %v3388_v21 = vmul.f32 %v1587_v52, %v3278_v14  ;;  %v3391_v22 = vmul.f32 %v1588_v53, %v3278_v14  ;;  %v3395_v26 = vmul.f32 %v1790_v59, %v3278_v14  ;;  %v613_v38 = vld [vmem:[#allocation8 + $0x40] sm:$0xff]  ;;  %v611_v59 = vld [vmem:[#allocation8 + $0x30] sm:$0xff] }
  0xb3   : > { %2711 = vmatmul.msk.f32.vlgmr.msrb.gmra.mxu1 %vm470_vm1, %v3297_v31  ;;  %2716 = vmatmul.msk.f32.vlgmr.msrb.gmra.mxu2 %vm470_vm1, %v3297_v31  ;;  %v3398_v27 = vmul.f32 %v1791_v60, %v3278_v14  ;;  %v3401_v28 = vmul.f32 %v1792_v61, %v3278_v14  ;;  %v3405_v33 = vmul.f32 %v1793_v1, %v3278_v14  ;;  %v609_v60 = vld [vmem:[#allocation8 + $0x20] sm:$0xff]  ;;  %v612_v61 = vld [vmem:[#allocation8 + $0x38] sm:$0xff]  ;;  %v606_v1 = vld [vmem:[#allocation8 + $0x8] sm:$0xff] }
  0xb4   : > { %2721 = vmatmul.msk.f32.vlgmr.msrb.gmra.mxu3 %vm470_vm1, %v3297_v31  ;;  %2726 = vmatmul.msk.f32.vlgmr.msra.gmra.mxu0 %vm470_vm1, %v3297_v31  ;;  %v615_v31 = vld [vmem:[#allocation8 + $0x50] sm:$0xff]  ;;  %v3408_v34 = vmul.f32 %v1794_v2, %v3278_v14  ;;  %v3411_v36 = vmul.f32 %v1996_v3, %v3278_v14  ;;  %v3415_v40 = vmul.f32 %v1997_v7, %v3278_v14  ;;  %v605_v3 = vld [vmem:[#allocation8] sm:$0xff]  ;;  %v608_v7 = vld [vmem:[#allocation8 + $0x18] sm:$0xff] }
  0xb5   : > { %881 = vmatpush.msra.mxu2 %v622_v54  ;;  %913 = vmatpush.msra.mxu3 %v623_v55  ;;  %v3418_v41 = vmul.f32 %v1998_v8, %v3278_v14  ;;  %v3421_v42 = vmul.f32 %v1999_v9, %v3278_v14  ;;  %v3424_v46 = vmul.f32 %v2000_v16, %v3278_v14  ;;  %v610_v55 = vld [vmem:[#allocation8 + $0x28] sm:$0xff]  ;;  %v607_v2 = vld [vmem:[#allocation8 + $0x10] sm:$0xff]  ;;  %v1008_v16 = vld [vmem:[#allocation8 + $0x2f8] sm:$0xff] }
  0xb6   : > { %849 = vmatpush.msra.mxu1 %v621_v10  ;;  %945 = vmatpush.msrb.mxu0 %v624_v11  ;;  %v3427_v47 = vmul.f32 %v2202_v17, %v3278_v14  ;;  %v3430_v48 = vmul.f32 %v2203_v18, %v3278_v14  ;;  %v3433_v52 = vmul.f32 %v2204_v23, %v3278_v14  ;;  %v639_v8 = vld [vmem:[%s3273_s22 + $0x11] sm:$0xff]  ;;  %v1005_v11 = vld [vmem:[#allocation8 + $0x2e0] sm:$0xff] }
  0xb7   : > { %882 = vmatpush.msra.mxu2 %v618_v19  ;;  %914 = vmatpush.msra.mxu3 %v619_v20  ;;  %v3436_v53 = vmul.f32 %v2205_v29, %v3278_v14  ;;  %v3439_v54 = vmul.f32 %v2206_v37, %v3278_v14  ;;  %v1006_v9 = vld [vmem:[#allocation8 + $0x2e8] sm:$0xff]  ;;  %v1007_v10 = vld [vmem:[#allocation8 + $0x2f0] sm:$0xff]  ;;  %v644_v17 = vmul.f32 %v639_v8, %v3278_v14  ;;  %v1001_v23 = vld [vmem:[#allocation8 + $0x2c0] sm:$0xff] }
  0xb8   : > { %850 = vmatpush.msra.mxu1 %v617_v24  ;;  %946 = vmatpush.msrb.mxu0 %v620_v25  ;;  %4315 = vst [vmem:[#allocation14_spill] sm:$0xff] %v3427_v47  ;;  %v1003_v18 = vld [vmem:[#allocation8 + $0x2d0] sm:$0xff]  ;;  %v998_v19 = vld [vmem:[#allocation8 + $0x2a8] sm:$0xff]  ;;  %v1004_v24 = vld [vmem:[#allocation8 + $0x2d8] sm:$0xff] }
  0xb9   : > { %4316 = vst [vmem:[#allocation15_spill] sm:$0xff] %v3430_v48  ;;  %883 = vmatpush.msra.mxu2 %v614_v30  ;;  %915 = vmatpush.msra.mxu3 %v615_v31  ;;  %v999_v20 = vld [vmem:[#allocation8 + $0x2b0] sm:$0xff]  ;;  %v994_v29 = vld [vmem:[#allocation8 + $0x288] sm:$0xff]  ;;  %v997_v37 = vld [vmem:[#allocation8 + $0x2a0] sm:$0xff] }
  0xba   : > { %4317 = vst [vmem:[#allocation16_spill] sm:$0xff] %v3433_v52  ;;  %851 = vmatpush.msra.mxu1 %v613_v38  ;;  %947 = vmatpush.msrb.mxu0 %v616_v39  ;;  %v640_v25 = vld [vmem:[%s3273_s22 + $0x19] sm:$0xff]  ;;  %v990_v39 = vld [vmem:[#allocation8 + $0x268] sm:$0xff]  ;;  %v2011_v52 = vld [vmem:[#allocation8 + $0x720] sm:$0xff] }
  0xbb   : > { %4318 = vst [vmem:[#allocation17_spill] sm:$0xff] %v3436_v53  ;;  %2712 = vmatmul.msk.f32.gmra.mxu1 %vm470_vm1, %v3300_v32  ;;  %2717 = vmatmul.msk.f32.gmra.mxu2 %vm470_vm1, %v3300_v32  ;;  %v995_v30 = vld [vmem:[#allocation8 + $0x290] sm:$0xff]  ;;  %v645_v31 = vmul.f32 %v640_v25, %v3278_v14  ;;  %v1000_v38 = vld [vmem:[#allocation8 + $0x2b8] sm:$0xff]  ;;  %v2012_v53 = vld [vmem:[#allocation8 + $0x728] sm:$0xff] }
  0xbc   : > { %4319 = vst [vmem:[#allocation18_spill] sm:$0xff] %v3439_v54  ;;  %2722 = vmatmul.msk.f32.gmra.mxu3 %vm470_vm1, %v3300_v32  ;;  %2727 = vmatmul.msk.f32.gmra.mxu0 %vm470_vm1, %v3300_v32  ;;  %v1002_v32 = vld [vmem:[#allocation8 + $0x2c8] sm:$0xff]  ;;  %v992_v8 = vld [vmem:[#allocation8 + $0x278] sm:$0xff]  ;;  %v2217_v47 = vld [vmem:[#allocation8 + $0x820] sm:$0xff] }
  0xbd   : > { %884 = vmatpush.msra.mxu2 %v610_v55  ;;  %916 = vmatpush.msra.mxu3 %v611_v59  ;;  %v991_v55 = vld [vmem:[#allocation8 + $0x270] sm:$0xff]  ;;  %v993_v59 = vld [vmem:[#allocation8 + $0x280] sm:$0xff]  ;;  %v980_v25 = vld [vmem:[#allocation8 + $0x218] sm:$0xff] }
  0xbe   : > { %852 = vmatpush.msra.mxu1 %v609_v60  ;;  %948 = vmatpush.msrb.mxu0 %v612_v61  ;;  %v996_v60 = vld [vmem:[#allocation8 + $0x298] sm:$0xff] }
  0xbf   : > { %885 = vmatpush.msra.mxu2 %v606_v1  ;;  %917 = vmatpush.msra.mxu3 %v607_v2  ;;  %v641_v61 = vld [vmem:[%s3273_s22 + $0x21] sm:$0xf]  ;;  %v986_v2 = vld [vmem:[#allocation8 + $0x248] sm:$0xff] }
  0xc0   : > { %853 = vmatpush.msra.mxu1 %v605_v3  ;;  %949 = vmatpush.msrb.mxu0 %v608_v7  ;;  %v646_v1 = vmul.f32 %v641_v61, %v3278_v14  ;;  %v987_v3 = vld [vmem:[#allocation8 + $0x250] sm:$0xff]  ;;  %v989_v7 = vld [vmem:[#allocation8 + $0x260] sm:$0xff]  ;;  %v1200_v61 = vld [vmem:[#allocation8 + $0x388] sm:$0xff] }
  0xc1   : > { %1064 = vmatpush.msrb.mxu2 %v1006_v9  ;;  %1096 = vmatpush.msrb.mxu3 %v1007_v10  ;;  %v982_v9 = vld [vmem:[#allocation8 + $0x228] sm:$0xff]  ;;  %v983_v10 = vld [vmem:[#allocation8 + $0x230] sm:$0xff] }
  0xc2   : > { %1032 = vmatpush.msrb.mxu1 %v1005_v11  ;;  %1128 = vmatpush.msra.mxu0 %v1008_v16  ;;  %v594_v11 = vld [vmem:[%s3273_s22] sm:$0xff] }
  0xc3   : > { %2713 = vmatmul.msk.f32.gmra.mxu1 %vm470_vm1, %v644_v17  ;;  %2718 = vmatmul.msk.f32.gmra.mxu2 %vm470_vm1, %v644_v17  ;;  %v985_v16 = vld [vmem:[#allocation8 + $0x240] sm:$0xff] }
  0xc4   : > { %2723 = vmatmul.msk.f32.gmra.mxu3 %vm470_vm1, %v644_v17  ;;  %2728 = vmatmul.msk.f32.gmra.mxu0 %vm470_vm1, %v644_v17  ;;  %v988_v17 = vld [vmem:[#allocation8 + $0x258] sm:$0xff] }
  0xc5   : > { %1065 = vmatpush.msrb.mxu2 %v1002_v32  ;;  %1097 = vmatpush.msrb.mxu3 %v1003_v18  ;;  %v600_v32 = vmul.f32 %v3278_v14, %v594_v11  ;;  %v978_v18 = vld [vmem:[#allocation8 + $0x208] sm:$0xff] }
  0xc6   : > { %1033 = vmatpush.msrb.mxu1 %v1001_v23  ;;  %1129 = vmatpush.msra.mxu0 %v1004_v24  ;;  %v984_v23 = vld [vmem:[#allocation8 + $0x238] sm:$0xff]  ;;  %v977_v24 = vld [vmem:[#allocation8 + $0x200] sm:$0xff]  ;;  %v1212_v14 = vld [vmem:[#allocation8 + $0x3e8] sm:$0xff] }
  0xc7   : > { %1066 = vmatpush.msrb.mxu2 %v998_v19  ;;  %1098 = vmatpush.msrb.mxu3 %v999_v20  ;;  %v979_v19 = vld [vmem:[#allocation8 + $0x210] sm:$0xff]  ;;  %v981_v20 = vld [vmem:[#allocation8 + $0x220] sm:$0xff]  ;;  %v1192_v11 = vld [vmem:[#allocation8 + $0x348] sm:$0xff] }
  0xc8   : > { %1034 = vmatpush.msrb.mxu1 %v997_v37  ;;  %1130 = vmatpush.msra.mxu0 %v1000_v38  ;;  %v1211_v37 = vld [vmem:[#allocation8 + $0x3e0] sm:$0xff]  ;;  %v1214_v38 = vld [vmem:[#allocation8 + $0x3f8] sm:$0xff] }
  0xc9   : > { %1067 = vmatpush.msrb.mxu2 %v994_v29  ;;  %1099 = vmatpush.msrb.mxu3 %v995_v30  ;;  %v1213_v29 = vld [vmem:[#allocation8 + $0x3f0] sm:$0xff]  ;;  %v1208_v30 = vld [vmem:[#allocation8 + $0x3c8] sm:$0xff] }
  0xca   : > { %1035 = vmatpush.msrb.mxu1 %v993_v59  ;;  %1131 = vmatpush.msra.mxu0 %v996_v60  ;;  %v1207_v59 = vld [vmem:[#allocation8 + $0x3c0] sm:$0xff]  ;;  %v1210_v60 = vld [vmem:[#allocation8 + $0x3d8] sm:$0xff] }
  0xcb   : > { %2714 = vmatmul.msk.f32.gmra.mxu1 %vm470_vm1, %v645_v31  ;;  %2719 = vmatmul.msk.f32.gmra.mxu2 %vm470_vm1, %v645_v31 }
  0xcc   : > { %2724 = vmatmul.msk.f32.gmra.mxu3 %vm470_vm1, %v645_v31  ;;  %2729 = vmatmul.msk.f32.gmra.mxu0 %vm470_vm1, %v645_v31  ;;  %v1209_v31 = vld [vmem:[#allocation8 + $0x3d0] sm:$0xff] }
  0xcd   : > { %1068 = vmatpush.msrb.mxu2 %v990_v39  ;;  %1100 = vmatpush.msrb.mxu3 %v991_v55  ;;  %v1204_v39 = vld [vmem:[#allocation8 + $0x3a8] sm:$0xff]  ;;  %v1205_v55 = vld [vmem:[#allocation8 + $0x3b0] sm:$0xff] }
  0xce   : > { %1036 = vmatpush.msrb.mxu1 %v989_v7  ;;  %1132 = vmatpush.msra.mxu0 %v992_v8  ;;  %v1196_v7 = vld [vmem:[#allocation8 + $0x368] sm:$0xff]  ;;  %v1197_v8 = vld [vmem:[#allocation8 + $0x370] sm:$0xff] }
  0xcf   : > { %1069 = vmatpush.msrb.mxu2 %v986_v2  ;;  %1101 = vmatpush.msrb.mxu3 %v987_v3  ;;  %v1203_v2 = vld [vmem:[#allocation8 + $0x3a0] sm:$0xff]  ;;  %v1206_v3 = vld [vmem:[#allocation8 + $0x3b8] sm:$0xff] }
  0xd0   : > { %1037 = vmatpush.msrb.mxu1 %v985_v16  ;;  %1133 = vmatpush.msra.mxu0 %v988_v17  ;;  %v1193_v16 = vld [vmem:[#allocation8 + $0x350] sm:$0xff]  ;;  %v1195_v17 = vld [vmem:[#allocation8 + $0x360] sm:$0xff] }
  0xd1   : > { %1070 = vmatpush.msrb.mxu2 %v982_v9  ;;  %1102 = vmatpush.msrb.mxu3 %v983_v10  ;;  %v1199_v9 = vld [vmem:[#allocation8 + $0x380] sm:$0xff]  ;;  %v1202_v10 = vld [vmem:[#allocation8 + $0x398] sm:$0xff] }
  0xd2   : > { %1038 = vmatpush.msrb.mxu1 %v981_v20  ;;  %1134 = vmatpush.msra.mxu0 %v984_v23  ;;  %v1191_v20 = vld [vmem:[#allocation8 + $0x340] sm:$0xff]  ;;  %v1194_v23 = vld [vmem:[#allocation8 + $0x358] sm:$0xff] }
  0xd3   : > { %2715 = vmatmul.msk.f32.gmra.mxu1 %vm470_vm1, %v646_v1  ;;  %2720 = vmatmul.msk.f32.gmra.mxu2 %vm470_vm1, %v646_v1 }
  0xd4   : > { %2725 = vmatmul.msk.f32.gmra.mxu3 %vm470_vm1, %v646_v1  ;;  %2730 = vmatmul.msk.f32.gmra.mxu0 %vm470_vm1, %v646_v1  ;;  %v1201_v1 = vld [vmem:[#allocation8 + $0x390] sm:$0xff] }
  0xd5   : > { %1071 = vmatpush.msrb.mxu2 %v978_v18  ;;  %1103 = vmatpush.msrb.mxu3 %v979_v19  ;;  %v1188_v18 = vld [vmem:[#allocation8 + $0x328] sm:$0xff]  ;;  %v1189_v19 = vld [vmem:[#allocation8 + $0x330] sm:$0xff] }
  0xd6   : > { %1039 = vmatpush.msrb.mxu1 %v977_v24  ;;  %1135 = vmatpush.msra.mxu0 %v980_v25  ;;  %v1185_v24 = vld [vmem:[#allocation8 + $0x310] sm:$0xff]  ;;  %v1187_v25 = vld [vmem:[#allocation8 + $0x320] sm:$0xff] }
  0xdb   : > { %2731 = vmatmul.msk.f32.vlgmr.msra.gmra.mxu1 %vm470_vm1, %v600_v32  ;;  %2736 = vmatmul.msk.f32.vlgmr.msra.gmra.mxu2 %vm470_vm1, %v600_v32 }
  0xdc   : > { %2741 = vmatmul.msk.f32.vlgmr.msra.gmra.mxu3 %vm470_vm1, %v600_v32  ;;  %2746 = vmatmul.msk.f32.vlgmr.msrb.gmra.mxu0 %vm470_vm1, %v600_v32  ;;  %v1198_v32 = vld [vmem:[#allocation8 + $0x378] sm:$0xff] }
  0xdd   : > { %1270 = vmatpush.msra.mxu2 %v1212_v14  ;;  %1302 = vmatpush.msra.mxu3 %v1213_v29  ;;  %v1190_v14 = vld [vmem:[#allocation8 + $0x338] sm:$0xff] }
  0xde   : > { %1238 = vmatpush.msra.mxu1 %v1211_v37  ;;  %1334 = vmatpush.msrb.mxu0 %v1214_v38  ;;  %v1186_v29 = vld [vmem:[#allocation8 + $0x318] sm:$0xff]  ;;  %v1417_v37 = vld [vmem:[#allocation8 + $0x4e0] sm:$0xff]  ;;  %v1410_v38 = vld [vmem:[#allocation8 + $0x4a8] sm:$0xff] }
  0xdf   : > { %1271 = vmatpush.msra.mxu2 %v1208_v30  ;;  %1303 = vmatpush.msra.mxu3 %v1209_v31  ;;  %v1419_v30 = vld [vmem:[#allocation8 + $0x4f0] sm:$0xff] }
  0xe0   : > { %1239 = vmatpush.msra.mxu1 %v1207_v59  ;;  %1335 = vmatpush.msrb.mxu0 %v1210_v60  ;;  %v1415_v31 = vld [vmem:[#allocation8 + $0x4d0] sm:$0xff]  ;;  %v1416_v59 = vld [vmem:[#allocation8 + $0x4d8] sm:$0xff]  ;;  %v1406_v60 = vld [vmem:[#allocation8 + $0x488] sm:$0xff] }
  0xe1   : > { %1272 = vmatpush.msra.mxu2 %v1204_v39  ;;  %1304 = vmatpush.msra.mxu3 %v1205_v55  ;;  %v1411_v39 = vld [vmem:[#allocation8 + $0x4b0] sm:$0xff]  ;;  %v1413_v55 = vld [vmem:[#allocation8 + $0x4c0] sm:$0xff] }
  0xe2   : > { %1240 = vmatpush.msra.mxu1 %v1203_v2  ;;  %1336 = vmatpush.msrb.mxu0 %v1206_v3  ;;  %v1412_v2 = vld [vmem:[#allocation8 + $0x4b8] sm:$0xff] }
  0xe3   : > { %2732 = vmatmul.msk.f32.gmra.mxu1 %vm470_vm1, %v3375_v13  ;;  %2737 = vmatmul.msk.f32.gmra.mxu2 %vm470_vm1, %v3375_v13 }
  0xe4   : > { %2742 = vmatmul.msk.f32.gmra.mxu3 %vm470_vm1, %v3375_v13  ;;  %2747 = vmatmul.msk.f32.gmra.mxu0 %vm470_vm1, %v3375_v13 }
  0xe5   : > { %1273 = vmatpush.msra.mxu2 %v1200_v61  ;;  %1305 = vmatpush.msra.mxu3 %v1201_v1  ;;  %v1407_v61 = vld [vmem:[#allocation8 + $0x490] sm:$0xff]  ;;  %v1409_v1 = vld [vmem:[#allocation8 + $0x4a0] sm:$0xff] }
  0xe6   : > { %1241 = vmatpush.msra.mxu1 %v1199_v9  ;;  %1337 = vmatpush.msrb.mxu0 %v1202_v10  ;;  %v1405_v9 = vld [vmem:[#allocation8 + $0x480] sm:$0xff]  ;;  %v1408_v10 = vld [vmem:[#allocation8 + $0x498] sm:$0xff] }
  0xe7   : > { %1274 = vmatpush.msra.mxu2 %v1196_v7  ;;  %1306 = vmatpush.msra.mxu3 %v1197_v8  ;;  %v1402_v7 = vld [vmem:[#allocation8 + $0x468] sm:$0xff]  ;;  %v1403_v8 = vld [vmem:[#allocation8 + $0x470] sm:$0xff] }
  0xe8   : > { %1242 = vmatpush.msra.mxu1 %v1195_v17  ;;  %1338 = vmatpush.msrb.mxu0 %v1198_v32  ;;  %v1401_v17 = vld [vmem:[#allocation8 + $0x460] sm:$0xff]  ;;  %v1404_v32 = vld [vmem:[#allocation8 + $0x478] sm:$0xff] }
  0xe9   : > { %1275 = vmatpush.msra.mxu2 %v1192_v11  ;;  %1307 = vmatpush.msra.mxu3 %v1193_v16  ;;  %v1398_v11 = vld [vmem:[#allocation8 + $0x448] sm:$0xff]  ;;  %v1399_v16 = vld [vmem:[#allocation8 + $0x450] sm:$0xff] }
  0xea   : > { %1243 = vmatpush.msra.mxu1 %v1191_v20  ;;  %1339 = vmatpush.msrb.mxu0 %v1194_v23  ;;  %v1395_v20 = vld [vmem:[#allocation8 + $0x430] sm:$0xff] }
  0xeb   : > { %2733 = vmatmul.msk.f32.gmra.mxu1 %vm470_vm1, %v3378_v15  ;;  %2738 = vmatmul.msk.f32.gmra.mxu2 %vm470_vm1, %v3378_v15 }
  0xec   : > { %2743 = vmatmul.msk.f32.gmra.mxu3 %vm470_vm1, %v3378_v15  ;;  %2748 = vmatmul.msk.f32.gmra.mxu0 %vm470_vm1, %v3378_v15 }
  0xed   : > { %1276 = vmatpush.msra.mxu2 %v1188_v18  ;;  %1308 = vmatpush.msra.mxu3 %v1189_v19  ;;  %v1394_v19 = vld [vmem:[#allocation8 + $0x428] sm:$0xff] }
  0xee   : > { %1244 = vmatpush.msra.mxu1 %v1187_v25  ;;  %1340 = vmatpush.msrb.mxu0 %v1190_v14  ;;  %v1390_v14 = vld [vmem:[#allocation8 + $0x408] sm:$0xff] }
  0xef   : > { %1309 = vmatpush.msra.mxu3 %v1185_v24  ;;  %v1400_v24 = vld [vmem:[#allocation8 + $0x458] sm:$0xff] }
  0xf0   : > { %1341 = vmatpush.msrb.mxu0 %v1186_v29  ;;  %v1393_v29 = vld [vmem:[#allocation8 + $0x420] sm:$0xff] }
  0xf3   : > { %2734 = vmatmul.msk.f32.gmra.mxu1 %vm470_vm1, %v3303_v35  ;;  %2739 = vmatmul.msk.f32.gmra.mxu2 %vm470_vm1, %v3303_v35 }
  0xf4   : > { %2744 = vmatmul.msk.f32.gmra.mxu3 %vm470_vm1, %v3303_v35  ;;  %2749 = vmatmul.msk.f32.gmra.mxu0 %vm470_vm1, %v3303_v35 }
  0xfb   : > { %2735 = vmatmul.msk.f32.gmra.mxu1 %vm470_vm1, %v3311_v43  ;;  %2740 = vmatmul.msk.f32.gmra.mxu2 %vm470_vm1, %v3311_v43 }
  0xfc   : > { %2745 = vmatmul.msk.f32.gmra.mxu3 %vm470_vm1, %v3311_v43  ;;  %2750 = vmatmul.msk.f32.gmra.mxu0 %vm470_vm1, %v3311_v43  ;;  %v1184_v43 = vld [vmem:[#allocation8 + $0x308] sm:$0xff] }
  0xfd   : > { %1277 = vmatpush.msra.mxu2 %v1184_v43  ;;  %v1397_v43 = vld [vmem:[#allocation8 + $0x440] sm:$0xff] }
 0x103   : > { %2751 = vmatmul.msk.f32.vlgmr.msrb.gmra.mxu1 %vm470_vm1, %v3314_v44  ;;  %2756 = vmatmul.msk.f32.vlgmr.msrb.gmra.mxu2 %vm470_vm1, %v3314_v44 }
 0x104   : > { %2761 = vmatmul.msk.f32.vlgmr.msrb.gmra.mxu3 %vm470_vm1, %v3314_v44  ;;  %2766 = vmatmul.msk.f32.vlgmr.msra.gmra.mxu0 %vm470_vm1, %v3314_v44  ;;  %v1183_v44 = vld [vmem:[#allocation8 + $0x300] sm:$0xff] }
 0x105   : > { %1245 = vmatpush.msra.mxu1 %v1183_v44  ;;  %1508 = vmatpush.msrb.mxu3 %v1419_v30  ;;  %v1391_v44 = vld [vmem:[#allocation8 + $0x410] sm:$0xff]  ;;  %v1624_v30 = vld [vmem:[#allocation8 + $0x5e8] sm:$0xff] }
 0x107   : > { %1509 = vmatpush.msrb.mxu3 %v1415_v31  ;;  %1444 = vmatpush.msrb.mxu1 %v1417_v37  ;;  %v1389_v31 = vld [vmem:[#allocation8 + $0x400] sm:$0xff]  ;;  %v1392_v37 = vld [vmem:[#allocation8 + $0x418] sm:$0xff] }
 0x109   : > { %1510 = vmatpush.msrb.mxu3 %v1411_v39  ;;  %1445 = vmatpush.msrb.mxu1 %v1413_v55 }
 0x10b   : > { %2752 = vmatmul.msk.f32.gmra.mxu1 %vm470_vm1, %v3317_v45  ;;  %2757 = vmatmul.msk.f32.gmra.mxu2 %vm470_vm1, %v3317_v45 }
 0x10c   : > { %2762 = vmatmul.msk.f32.gmra.mxu3 %vm470_vm1, %v3317_v45  ;;  %2767 = vmatmul.msk.f32.gmra.mxu0 %vm470_vm1, %v3317_v45  ;;  %v1418_v45 = vld [vmem:[#allocation8 + $0x4e8] sm:$0xff] }
 0x10d   : > { %1476 = vmatpush.msrb.mxu2 %v1418_v45  ;;  %1511 = vmatpush.msrb.mxu3 %v1407_v61  ;;  %v1396_v45 = vld [vmem:[#allocation8 + $0x438] sm:$0xff] }
 0x10e   : > { %1446 = vmatpush.msrb.mxu1 %v1409_v1  ;;  %v1626_v61 = vld [vmem:[#allocation8 + $0x5f8] sm:$0xff]  ;;  %v1616_v1 = vld [vmem:[#allocation8 + $0x5a8] sm:$0xff] }
 0x10f   : > { %1512 = vmatpush.msrb.mxu3 %v1403_v8 }
 0x110   : > { %1447 = vmatpush.msrb.mxu1 %v1405_v9 }
 0x111   : > { %1513 = vmatpush.msrb.mxu3 %v1399_v16 }
 0x112   : > { %1448 = vmatpush.msrb.mxu1 %v1401_v17  ;;  %v1613_v17 = vld [vmem:[#allocation8 + $0x590] sm:$0xff] }
 0x113   : > { %2753 = vmatmul.msk.f32.gmra.mxu1 %vm470_vm1, %v3321_v49  ;;  %2758 = vmatmul.msk.f32.gmra.mxu2 %vm470_vm1, %v3321_v49 }
 0x114   : > { %2763 = vmatmul.msk.f32.gmra.mxu3 %vm470_vm1, %v3321_v49  ;;  %2768 = vmatmul.msk.f32.gmra.mxu0 %vm470_vm1, %v3321_v49  ;;  %v1414_v49 = vld [vmem:[#allocation8 + $0x4c8] sm:$0xff] }
 0x115   : > { %1477 = vmatpush.msrb.mxu2 %v1414_v49  ;;  %1514 = vmatpush.msrb.mxu3 %v1395_v20  ;;  %v1625_v49 = vld [vmem:[#allocation8 + $0x5f0] sm:$0xff] }
 0x116   : > { %1449 = vmatpush.msrb.mxu1 %v1397_v43 }
 0x117   : > { %1478 = vmatpush.msrb.mxu2 %v1410_v38  ;;  %1515 = vmatpush.msrb.mxu3 %v1391_v44  ;;  %v1609_v44 = vld [vmem:[#allocation8 + $0x570] sm:$0xff] }
 0x118   : > { %1450 = vmatpush.msrb.mxu1 %v1393_v29 }
 0x119   : > { %1479 = vmatpush.msrb.mxu2 %v1406_v60  ;;  %v1623_v60 = vld [vmem:[#allocation8 + $0x5e0] sm:$0xff] }
 0x11a   : > { %1451 = vmatpush.msrb.mxu1 %v1389_v31  ;;  %v1607_v31 = vld [vmem:[#allocation8 + $0x560] sm:$0xff] }
 0x11b   : > { %2754 = vmatmul.msk.f32.gmra.mxu1 %vm470_vm1, %v3324_v50  ;;  %2759 = vmatmul.msk.f32.gmra.mxu2 %vm470_vm1, %v3324_v50 }
 0x11c   : > { %2764 = vmatmul.msk.f32.gmra.mxu3 %vm470_vm1, %v3324_v50  ;;  %2769 = vmatmul.msk.f32.gmra.mxu0 %vm470_vm1, %v3324_v50  ;;  %v1420_v50 = vld [vmem:[#allocation8 + $0x4f8] sm:$0xff] }
 0x11d   : > { %1540 = vmatpush.msra.mxu0 %v1420_v50  ;;  %1480 = vmatpush.msrb.mxu2 %v1402_v7 }
 0x11f   : > { %1541 = vmatpush.msra.mxu0 %v1416_v59  ;;  %1481 = vmatpush.msrb.mxu2 %v1398_v11  ;;  %v1621_v59 = vld [vmem:[#allocation8 + $0x5d0] sm:$0xff]  ;;  %v1622_v11 = vld [vmem:[#allocation8 + $0x5d8] sm:$0xff] }
 0x121   : > { %1542 = vmatpush.msra.mxu0 %v1412_v2  ;;  %1482 = vmatpush.msrb.mxu2 %v1394_v19  ;;  %v1617_v2 = vld [vmem:[#allocation8 + $0x5b0] sm:$0xff]  ;;  %v1618_v19 = vld [vmem:[#allocation8 + $0x5b8] sm:$0xff] }
 0x123   : > { %2755 = vmatmul.msk.f32.gmra.mxu1 %vm470_vm1, %v3327_v51  ;;  %2760 = vmatmul.msk.f32.gmra.mxu2 %vm470_vm1, %v3327_v51 }
 0x124   : > { %2765 = vmatmul.msk.f32.gmra.mxu3 %vm470_vm1, %v3327_v51  ;;  %2770 = vmatmul.msk.f32.gmra.mxu0 %vm470_vm1, %v3327_v51 }
 0x125   : > { %1543 = vmatpush.msra.mxu0 %v1408_v10  ;;  %1483 = vmatpush.msrb.mxu2 %v1390_v14  ;;  %v1619_v10 = vld [vmem:[#allocation8 + $0x5c0] sm:$0xff]  ;;  %v1608_v14 = vld [vmem:[#allocation8 + $0x568] sm:$0xff] }
 0x127   : > { %1544 = vmatpush.msra.mxu0 %v1404_v32  ;;  %v1615_v32 = vld [vmem:[#allocation8 + $0x5a0] sm:$0xff] }
 0x128   : > { %v3545_v3 = vpop.f32.mrf.mxu1 }
 0x129   : > { %4320 = vst [vmem:[#allocation19_spill] sm:$0xff] %v3545_v3  ;;  %v3547_v51 = vpop.f32.mrf.mxu0  ;;  %1545 = vmatpush.msra.mxu0 %v1400_v24  ;;  %v2031_v3 = vld [vmem:[#allocation8 + $0x7c0] sm:$0xff] }
 0x12a   : > { %4321 = vst [vmem:[#allocation20_spill] sm:$0xff] %v3547_v51 }
 0x12b   : > { %2771 = vmatmul.msk.f32.vlgmr.msra.gmra.mxu1 %vm470_vm1, %v3332_v56  ;;  %2776 = vmatmul.msk.f32.vlgmr.msra.gmra.mxu2 %vm470_vm1, %v3332_v56 }
 0x12c   : > { %2781 = vmatmul.msk.f32.vlgmr.msra.gmra.mxu3 %vm470_vm1, %v3332_v56  ;;  %2786 = vmatmul.msk.f32.vlgmr.msrb.gmra.mxu0 %vm470_vm1, %v3332_v56 }
 0x12d   : > { %1546 = vmatpush.msra.mxu0 %v1396_v45  ;;  %1682 = vmatpush.msra.mxu2 %v1624_v30  ;;  %v1611_v45 = vld [vmem:[#allocation8 + $0x580] sm:$0xff]  ;;  %v1604_v30 = vld [vmem:[#allocation8 + $0x548] sm:$0xff] }
 0x12e   : > { %v3557_v18 = vpop.f32.mrf.mxu2  ;;  %1714 = vmatpush.msra.mxu3 %v1625_v49  ;;  %1650 = vmatpush.msra.mxu1 %v1623_v60  ;;  %v1605_v49 = vld [vmem:[#allocation8 + $0x550] sm:$0xff] }
 0x12f   : > { %4322 = vst [vmem:[#allocation21_spill] sm:$0xff] %v3557_v18  ;;  %v3559_v23 = vpop.f32.mrf.mxu3  ;;  %1547 = vmatpush.msra.mxu0 %v1392_v37  ;;  %v1610_v37 = vld [vmem:[#allocation8 + $0x578] sm:$0xff]  ;;  %v1805_v18 = vld [vmem:[#allocation8 + $0x620] sm:$0xff] }
 0x130   : > { %4323 = vst [vmem:[#allocation22_spill] sm:$0xff] %v3559_v23  ;;  %v3561_v25 = vpop.f32.mrf.mxu1  ;;  %1715 = vmatpush.msra.mxu3 %v1621_v59  ;;  %1651 = vmatpush.msra.mxu1 %v1619_v10  ;;  %v1606_v10 = vld [vmem:[#allocation8 + $0x558] sm:$0xff]  ;;  %v1806_v23 = vld [vmem:[#allocation8 + $0x628] sm:$0xff] }
 0x131   : > { %v3563_v56 = vpop.f32.mrf.mxu0  ;;  %1746 = vmatpush.msrb.mxu0 %v1626_v61 }
 0x132   : > { %1716 = vmatpush.msra.mxu3 %v1617_v2  ;;  %1652 = vmatpush.msra.mxu1 %v1615_v32  ;;  %v1603_v2 = vld [vmem:[#allocation8 + $0x540] sm:$0xff]  ;;  %v1596_v32 = vld [vmem:[#allocation8 + $0x508] sm:$0xff] }
 0x133   : > { %2772 = vmatmul.msk.f32.gmra.mxu1 %vm470_vm1, %v3335_v57  ;;  %2777 = vmatmul.msk.f32.gmra.mxu2 %vm470_vm1, %v3335_v57 }
 0x134   : > { %2782 = vmatmul.msk.f32.gmra.mxu3 %vm470_vm1, %v3335_v57  ;;  %2787 = vmatmul.msk.f32.gmra.mxu0 %vm470_vm1, %v3335_v57  ;;  %v1620_v57 = vld [vmem:[#allocation8 + $0x5c8] sm:$0xff] }
 0x135   : > { %1683 = vmatpush.msra.mxu2 %v1620_v57  ;;  %1747 = vmatpush.msrb.mxu0 %v1622_v11 }
 0x136   : > { %v3573_v50 = vpop.f32.mrf.mxu2  ;;  %1717 = vmatpush.msra.mxu3 %v1613_v17  ;;  %1653 = vmatpush.msra.mxu1 %v1611_v45  ;;  %v1602_v45 = vld [vmem:[#allocation8 + $0x538] sm:$0xff] }
 0x137   : > { %v3575_v38 = vpop.f32.mrf.mxu3  ;;  %1684 = vmatpush.msra.mxu2 %v1616_v1  ;;  %1748 = vmatpush.msrb.mxu0 %v1618_v19  ;;  %v1600_v1 = vld [vmem:[#allocation8 + $0x528] sm:$0xff]  ;;  %v1597_v19 = vld [vmem:[#allocation8 + $0x510] sm:$0xff] }
 0x138   : > { %v3577_v39 = vpop.f32.mrf.mxu1  ;;  %1718 = vmatpush.msra.mxu3 %v1609_v44  ;;  %1654 = vmatpush.msra.mxu1 %v1607_v31 }
 0x139   : > { %v3579_v55 = vpop.f32.mrf.mxu0 }
 0x13a   : > { %1719 = vmatpush.msra.mxu3 %v1605_v49  ;;  %1655 = vmatpush.msra.mxu1 %v1603_v2  ;;  %v1831_v49 = vld [vmem:[#allocation8 + $0x6f0] sm:$0xff] }
 0x13b   : > { %2773 = vmatmul.msk.f32.gmra.mxu1 %vm470_vm1, %v3338_v58  ;;  %2778 = vmatmul.msk.f32.gmra.mxu2 %vm470_vm1, %v3338_v58 }
 0x13c   : > { %2783 = vmatmul.msk.f32.gmra.mxu3 %vm470_vm1, %v3338_v58  ;;  %2788 = vmatmul.msk.f32.gmra.mxu0 %vm470_vm1, %v3338_v58  ;;  %v1612_v58 = vld [vmem:[#allocation8 + $0x588] sm:$0xff] }
 0x13d   : > { %1685 = vmatpush.msra.mxu2 %v1612_v58 }
 0x13e   : > { %v3589_v7 = vpop.f32.mrf.mxu2 }
 0x13f   : > { %v3591_v8 = vpop.f32.mrf.mxu3  ;;  %1686 = vmatpush.msra.mxu2 %v1608_v14  ;;  %v1599_v14 = vld [vmem:[#allocation8 + $0x520] sm:$0xff] }
 0x140   : > { %v3593_v9 = vpop.f32.mrf.mxu1  ;;  %1656 = vmatpush.msra.mxu1 %v1599_v14  ;;  %v1832_v14 = vld [vmem:[#allocation8 + $0x6f8] sm:$0xff] }
 0x141   : > { %v3595_v16 = vpop.f32.mrf.mxu0  ;;  %1687 = vmatpush.msra.mxu2 %v1604_v30  ;;  %v1830_v30 = vld [vmem:[#allocation8 + $0x6e8] sm:$0xff] }
 0x143   : > { %2774 = vmatmul.msk.f32.gmra.mxu1 %vm470_vm1, %v3344_v62  ;;  %2779 = vmatmul.msk.f32.gmra.mxu2 %vm470_vm1, %v3344_v62 }
 0x144   : > { %2784 = vmatmul.msk.f32.gmra.mxu3 %vm470_vm1, %v3344_v62  ;;  %2789 = vmatmul.msk.f32.gmra.mxu0 %vm470_vm1, %v3344_v62  ;;  %v1614_v62 = vld [vmem:[#allocation8 + $0x598] sm:$0xff] }
 0x145   : > { %1749 = vmatpush.msrb.mxu0 %v1614_v62  ;;  %1688 = vmatpush.msra.mxu2 %v1600_v1  ;;  %v1598_v62 = vld [vmem:[#allocation8 + $0x518] sm:$0xff] }
 0x146   : > { %v3605_v20 = vpop.f32.mrf.mxu2 }
 0x147   : > { %v3607_v43 = vpop.f32.mrf.mxu3  ;;  %1750 = vmatpush.msrb.mxu0 %v1610_v37  ;;  %1689 = vmatpush.msra.mxu2 %v1596_v32  ;;  %v1826_v32 = vld [vmem:[#allocation8 + $0x6c8] sm:$0xff] }
 0x148   : > { %v3609_v24 = vpop.f32.mrf.mxu1 }
 0x149   : > { %v3611_v29 = vpop.f32.mrf.mxu0  ;;  %1751 = vmatpush.msrb.mxu0 %v1606_v10 }
 0x14b   : > { %2775 = vmatmul.msk.f32.gmra.mxu1 %vm470_vm1, %v3347_v63  ;;  %2780 = vmatmul.msk.f32.gmra.mxu2 %vm470_vm1, %v3347_v63 }
 0x14c   : > { %2785 = vmatmul.msk.f32.gmra.mxu3 %vm470_vm1, %v3347_v63  ;;  %2790 = vmatmul.msk.f32.gmra.mxu0 %vm470_vm1, %v3347_v63  ;;  %v1601_v63 = vld [vmem:[#allocation8 + $0x530] sm:$0xff] }
 0x14d   : > { %1720 = vmatpush.msra.mxu3 %v1601_v63  ;;  %1752 = vmatpush.msrb.mxu0 %v1602_v45 }
 0x14e   : > { %v3621_v57 = vpop.f32.mrf.mxu2 }
 0x14f   : > { %v3623_v59 = vpop.f32.mrf.mxu3  ;;  %1721 = vmatpush.msra.mxu3 %v1597_v19  ;;  %1753 = vmatpush.msrb.mxu0 %v1598_v62  ;;  %v1829_v19 = vld [vmem:[#allocation8 + $0x6e0] sm:$0xff] }
 0x150   : > { %v3625_v60 = vpop.f32.mrf.mxu1 }
 0x151   : > { %v3627_v61 = vpop.f32.mrf.mxu0 }
 0x153   : > { %2791 = vmatmul.msk.f32.vlgmr.msrb.gmra.mxu1 %vm470_vm1, %v3350_v0  ;;  %2796 = vmatmul.msk.f32.vlgmr.msrb.gmra.mxu2 %vm470_vm1, %v3350_v0 }
 0x154   : > { %2801 = vmatmul.msk.f32.vlgmr.msrb.gmra.mxu3 %vm470_vm1, %v3350_v0  ;;  %2806 = vmatmul.msk.f32.vlgmr.msra.gmra.mxu0 %vm470_vm1, %v3350_v0  ;;  %v1595_v0 = vld [vmem:[#allocation8 + $0x500] sm:$0xff] }
 0x155   : > { %1657 = vmatpush.msra.mxu1 %v1595_v0  ;;  %1888 = vmatpush.msrb.mxu2 %v1830_v30 }
 0x156   : > { %v3637_v11 = vpop.f32.mrf.mxu2  ;;  %1920 = vmatpush.msrb.mxu3 %v1831_v49  ;;  %1952 = vmatpush.msra.mxu0 %v1832_v14 }
 0x157   : > { %v3639_v58 = vpop.f32.mrf.mxu3  ;;  %1889 = vmatpush.msrb.mxu2 %v1826_v32  ;;  %1856 = vmatpush.msrb.mxu1 %v1829_v19  ;;  %v1818_v32 = vld [vmem:[#allocation8 + $0x688] sm:$0xff] }
 0x158   : > { %v3641_v17 = vpop.f32.mrf.mxu1 }
 0x159   : > { %v3643_v44 = vpop.f32.mrf.mxu0 }
 0x15b   : > { %2792 = vmatmul.msk.f32.gmra.mxu1 %vm470_vm1, %v3356_v4  ;;  %2797 = vmatmul.msk.f32.gmra.mxu2 %vm470_vm1, %v3356_v4 }
 0x15c   : > { %2802 = vmatmul.msk.f32.gmra.mxu3 %vm470_vm1, %v3356_v4  ;;  %2807 = vmatmul.msk.f32.gmra.mxu0 %vm470_vm1, %v3356_v4  ;;  %v1827_v4 = vld [vmem:[#allocation8 + $0x6d0] sm:$0xff] }
 0x15d   : > { %1921 = vmatpush.msrb.mxu3 %v1827_v4  ;;  %v1819_v4 = vld [vmem:[#allocation8 + $0x690] sm:$0xff] }
 0x15e   : > { %v887_v31 = vpop.f32.mrf.mxu2 }
 0x15f   : > { %v3654_v37 = vadd.f32 %v887_v31, %v3573_v50  ;;  %v919_v1 = vpop.f32.mrf.mxu3  ;;  %v1822_v50 = vld [vmem:[#allocation8 + $0x6a8] sm:$0xff]  ;;  %v1825_v31 = vld [vmem:[#allocation8 + $0x6c0] sm:$0xff] }
 0x160   : > { %v3657_v63 = vadd.f32 %v919_v1, %v3575_v38  ;;  %v3659_v2 = vpop.f32.mrf.mxu1  ;;  %v1823_v38 = vld [vmem:[#allocation8 + $0x6b0] sm:$0xff]  ;;  %1890 = vmatpush.msrb.mxu2 %v1822_v50  ;;  %1857 = vmatpush.msrb.mxu1 %v1825_v31 }
 0x161   : > { %v3661_v10 = vpop.f32.mrf.mxu0  ;;  %1922 = vmatpush.msrb.mxu3 %v1823_v38  ;;  %v1815_v31 = vld [vmem:[#allocation8 + $0x670] sm:$0xff] }
 0x162   : > { %1891 = vmatpush.msrb.mxu2 %v1818_v32  ;;  %v1820_v32 = vld [vmem:[#allocation8 + $0x698] sm:$0xff] }
 0x163   : > { %2793 = vmatmul.msk.f32.gmra.mxu1 %vm470_vm1, %v3359_v5  ;;  %2798 = vmatmul.msk.f32.gmra.mxu2 %vm470_vm1, %v3359_v5 }
 0x164   : > { %2803 = vmatmul.msk.f32.gmra.mxu3 %vm470_vm1, %v3359_v5  ;;  %2808 = vmatmul.msk.f32.gmra.mxu0 %vm470_vm1, %v3359_v5  ;;  %v1828_v5 = vld [vmem:[#allocation8 + $0x6d8] sm:$0xff] }
 0x165   : > { %1953 = vmatpush.msra.mxu0 %v1828_v5  ;;  %1923 = vmatpush.msrb.mxu3 %v1819_v4  ;;  %v1813_v4 = vld [vmem:[#allocation8 + $0x660] sm:$0xff] }
 0x166   : > { %v890_v45 = vpop.f32.mrf.mxu2 }
 0x167   : > { %v3672_v0 = vadd.f32 %v890_v45, %v3589_v7  ;;  %v922_v62 = vpop.f32.mrf.mxu3  ;;  %v1821_v7 = vld [vmem:[#allocation8 + $0x6a0] sm:$0xff]  ;;  %1924 = vmatpush.msrb.mxu3 %v1815_v31 }
 0x168   : > { %v3675_v30 = vadd.f32 %v922_v62, %v3591_v8  ;;  %v3677_v49 = vpop.f32.mrf.mxu1  ;;  %v1824_v8 = vld [vmem:[#allocation8 + $0x6b8] sm:$0xff]  ;;  %1858 = vmatpush.msrb.mxu1 %v1821_v7  ;;  %v1814_v62 = vld [vmem:[#allocation8 + $0x668] sm:$0xff] }
 0x169   : > { %v3679_v1 = vpop.f32.mrf.mxu0  ;;  %1954 = vmatpush.msra.mxu0 %v1824_v8  ;;  %1892 = vmatpush.msrb.mxu2 %v1814_v62  ;;  %v1816_v7 = vld [vmem:[#allocation8 + $0x678] sm:$0xff] }
 0x16b   : > { %2794 = vmatmul.msk.f32.gmra.mxu1 %vm470_vm1, %v3362_v6  ;;  %2799 = vmatmul.msk.f32.gmra.mxu2 %vm470_vm1, %v3362_v6 }
 0x16c   : > { %2804 = vmatmul.msk.f32.gmra.mxu3 %vm470_vm1, %v3362_v6  ;;  %2809 = vmatmul.msk.f32.gmra.mxu0 %vm470_vm1, %v3362_v6  ;;  %v1817_v6 = vld [vmem:[#allocation8 + $0x680] sm:$0xff] }
 0x16d   : > { %1859 = vmatpush.msrb.mxu1 %v1817_v6  ;;  %1955 = vmatpush.msra.mxu0 %v1820_v32  ;;  %v1807_v6 = vld [vmem:[#allocation8 + $0x630] sm:$0xff]  ;;  %v1812_v32 = vld [vmem:[#allocation8 + $0x658] sm:$0xff] }
 0x16e   : > { %v893_v19 = vpop.f32.mrf.mxu2 }
 0x16f   : > { %v3690_v14 = vadd.f32 %v893_v19, %v3605_v20  ;;  %v925_v50 = vpop.f32.mrf.mxu3  ;;  %v1810_v20 = vld [vmem:[#allocation8 + $0x648] sm:$0xff]  ;;  %1860 = vmatpush.msrb.mxu1 %v1813_v4  ;;  %1956 = vmatpush.msra.mxu0 %v1816_v7 }
 0x170   : > { %v3693_v38 = vadd.f32 %v925_v50, %v3607_v43  ;;  %v3695_v45 = vpop.f32.mrf.mxu1  ;;  %v1811_v43 = vld [vmem:[#allocation8 + $0x650] sm:$0xff]  ;;  %1893 = vmatpush.msrb.mxu2 %v1810_v20 }
 0x171   : > { %v3697_v5 = vpop.f32.mrf.mxu0  ;;  %1925 = vmatpush.msrb.mxu3 %v1811_v43  ;;  %1957 = vmatpush.msra.mxu0 %v1812_v32 }
 0x172   : > { %1894 = vmatpush.msrb.mxu2 %v1806_v23  ;;  %v1801_v23 = vld [vmem:[#allocation8 + $0x600] sm:$0xff] }
 0x173   : > { %2795 = vmatmul.msk.f32.gmra.mxu1 %vm470_vm1, %v3372_v12  ;;  %2800 = vmatmul.msk.f32.gmra.mxu2 %vm470_vm1, %v3372_v12 }
 0x174   : > { %2805 = vmatmul.msk.f32.gmra.mxu3 %vm470_vm1, %v3372_v12  ;;  %2810 = vmatmul.msk.f32.gmra.mxu0 %vm470_vm1, %v3372_v12 }
 0x175   : > { %1926 = vmatpush.msrb.mxu3 %v1807_v6  ;;  %v1804_v6 = vld [vmem:[#allocation8 + $0x618] sm:$0xff] }
 0x176   : > { %v896_v8 = vpop.f32.mrf.mxu2 }
 0x177   : > { %v3708_v19 = vadd.f32 %v896_v8, %v3621_v57  ;;  %v928_v50 = vpop.f32.mrf.mxu3  ;;  %v1809_v57 = vld [vmem:[#allocation8 + $0x640] sm:$0xff]  ;;  %v1802_v8 = vld [vmem:[#allocation8 + $0x608] sm:$0xff] }
 0x178   : > { %v3711_v62 = vadd.f32 %v928_v50, %v3623_v59  ;;  %v3713_v31 = vpop.f32.mrf.mxu1  ;;  %1861 = vmatpush.msrb.mxu1 %v1809_v57  ;;  %v1803_v50 = vld [vmem:[#allocation8 + $0x610] sm:$0xff]  ;;  %1895 = vmatpush.msrb.mxu2 %v1802_v8 }
 0x179   : > { %v3715_v12 = vpop.f32.mrf.mxu0  ;;  %1927 = vmatpush.msrb.mxu3 %v1803_v50  ;;  %v2032_v50 = vld [vmem:[#allocation8 + $0x7c8] sm:$0xff] }
 0x17a   : > { %1862 = vmatpush.msrb.mxu1 %v1805_v18 }
 0x17b   : > { %2811 = vmatmul.msk.f32.vlgmr.msra.gmra.mxu1 %vm470_vm1, %v3375_v13  ;;  %2816 = vmatmul.msk.f32.vlgmr.msra.gmra.mxu2 %vm470_vm1, %v3375_v13 }
 0x17c   : > { %2821 = vmatmul.msk.f32.vlgmr.msra.gmra.mxu3 %vm470_vm1, %v3375_v13  ;;  %2826 = vmatmul.msk.f32.vlgmr.msrb.gmra.mxu0 %vm470_vm1, %v3375_v13  ;;  %v1808_v13 = vld [vmem:[#allocation8 + $0x638] sm:$0xff] }
 0x17d   : > { %1958 = vmatpush.msra.mxu0 %v1808_v13  ;;  %1863 = vmatpush.msrb.mxu1 %v1801_v23  ;;  %v2035_v13 = vld [vmem:[#allocation8 + $0x7e0] sm:$0xff]  ;;  %v2038_v23 = vld [vmem:[#allocation8 + $0x7f8] sm:$0xff] }
 0x17e   : > { %v899_v59 = vpop.f32.mrf.mxu2 }
 0x17f   : > { %v3726_v20 = vadd.f32 %v899_v59, %v3637_v11  ;;  %v931_v43 = vpop.f32.mrf.mxu3  ;;  %v2036_v11 = vld [vmem:[#allocation8 + $0x7e8] sm:$0xff]  ;;  %1959 = vmatpush.msra.mxu0 %v1804_v6  ;;  %2062 = vmatpush.msra.mxu1 %v2035_v13 }
 0x180   : > { %v3729_v4 = vadd.f32 %v931_v43, %v3639_v58  ;;  %v3731_v7 = vpop.f32.mrf.mxu1  ;;  %v2037_v58 = vld [vmem:[#allocation8 + $0x7f0] sm:$0xff]  ;;  %2094 = vmatpush.msra.mxu2 %v2036_v11 }
 0x181   : > { %4324 = vst [vmem:[#allocation23_spill] sm:$0xff] %v3731_v7  ;;  %v3733_v51 = vpop.f32.mrf.mxu0  ;;  %2126 = vmatpush.msra.mxu3 %v2037_v58  ;;  %2158 = vmatpush.msrb.mxu0 %v2038_v23 }
 0x182   : > { %4325 = vst [vmem:[#allocation24_spill] sm:$0xff] %v3733_v51  ;;  %2095 = vmatpush.msra.mxu2 %v2032_v50  ;;  %2063 = vmatpush.msra.mxu1 %v2031_v3  ;;  %v2024_v50 = vld [vmem:[#allocation8 + $0x788] sm:$0xff] }
 0x183   : > { %2812 = vmatmul.msk.f32.gmra.mxu1 %vm470_vm1, %v3378_v15  ;;  %2817 = vmatmul.msk.f32.gmra.mxu2 %vm470_vm1, %v3378_v15  ;;  %v2218_v51 = vld [vmem:[#allocation8 + $0x828] sm:$0xff] }
 0x184   : > { %2822 = vmatmul.msk.f32.gmra.mxu3 %vm470_vm1, %v3378_v15  ;;  %2827 = vmatmul.msk.f32.gmra.mxu0 %vm470_vm1, %v3378_v15  ;;  %v2033_v15 = vld [vmem:[#allocation8 + $0x7d0] sm:$0xff] }
 0x185   : > { %2127 = vmatpush.msra.mxu3 %v2033_v15  ;;  %v2025_v15 = vld [vmem:[#allocation8 + $0x790] sm:$0xff] }
 0x186   : > { %v1073_v18 = vpop.f32.mrf.mxu2 }
 0x187   : > { %v3744_v57 = vadd.f32 %v1073_v18, %v3654_v37  ;;  %v1105_v32 = vpop.f32.mrf.mxu3  ;;  %v2028_v37 = vld [vmem:[#allocation8 + $0x7a8] sm:$0xff] }
 0x188   : > { %v3747_v59 = vadd.f32 %v1105_v32, %v3657_v63  ;;  %v3749_v43 = vpop.f32.mrf.mxu1  ;;  %v2029_v63 = vld [vmem:[#allocation8 + $0x7b0] sm:$0xff]  ;;  %2096 = vmatpush.msra.mxu2 %v2028_v37 }
 0x189   : > { %v3751_v8 = vpop.f32.mrf.mxu0  ;;  %2128 = vmatpush.msra.mxu3 %v2029_v63 }
 0x18a   : > { %2097 = vmatpush.msra.mxu2 %v2024_v50  ;;  %v2026_v50 = vld [vmem:[#allocation8 + $0x798] sm:$0xff] }
 0x18b   : > { %2813 = vmatmul.msk.f32.gmra.mxu1 %vm470_vm1, %v3303_v35  ;;  %2818 = vmatmul.msk.f32.gmra.mxu2 %vm470_vm1, %v3303_v35 }
 0x18c   : > { %2823 = vmatmul.msk.f32.gmra.mxu3 %vm470_vm1, %v3303_v35  ;;  %2828 = vmatmul.msk.f32.gmra.mxu0 %vm470_vm1, %v3303_v35  ;;  %v2034_v35 = vld [vmem:[#allocation8 + $0x7d8] sm:$0xff] }
 0x18d   : > { %2159 = vmatpush.msrb.mxu0 %v2034_v35  ;;  %2129 = vmatpush.msra.mxu3 %v2025_v15  ;;  %v2019_v15 = vld [vmem:[#allocation8 + $0x760] sm:$0xff] }
 0x18e   : > { %v1076_v6 = vpop.f32.mrf.mxu2 }
 0x18f   : > { %v3762_v11 = vadd.f32 %v1076_v6, %v3672_v0  ;;  %v1108_v58 = vpop.f32.mrf.mxu3  ;;  %v2027_v0 = vld [vmem:[#allocation8 + $0x7a0] sm:$0xff]  ;;  %v2020_v6 = vld [vmem:[#allocation8 + $0x768] sm:$0xff] }
 0x190   : > { %v3765_v18 = vadd.f32 %v1108_v58, %v3675_v30  ;;  %v3767_v32 = vpop.f32.mrf.mxu1  ;;  %v2030_v30 = vld [vmem:[#allocation8 + $0x7b8] sm:$0xff]  ;;  %2064 = vmatpush.msra.mxu1 %v2027_v0  ;;  %v2021_v58 = vld [vmem:[#allocation8 + $0x770] sm:$0xff]  ;;  %2098 = vmatpush.msra.mxu2 %v2020_v6 }
 0x191   : > { %v3769_v54 = vpop.f32.mrf.mxu0  ;;  %2160 = vmatpush.msrb.mxu0 %v2030_v30  ;;  %2130 = vmatpush.msra.mxu3 %v2021_v58  ;;  %v2022_v0 = vld [vmem:[#allocation8 + $0x778] sm:$0xff] }
 0x193   : > { %2814 = vmatmul.msk.f32.gmra.mxu1 %vm470_vm1, %v3388_v21  ;;  %2819 = vmatmul.msk.f32.gmra.mxu2 %vm470_vm1, %v3388_v21 }
 0x194   : > { %2824 = vmatmul.msk.f32.gmra.mxu3 %vm470_vm1, %v3388_v21  ;;  %2829 = vmatmul.msk.f32.gmra.mxu0 %vm470_vm1, %v3388_v21  ;;  %v2023_v21 = vld [vmem:[#allocation8 + $0x780] sm:$0xff] }
 0x195   : > { %2065 = vmatpush.msra.mxu1 %v2023_v21  ;;  %2161 = vmatpush.msrb.mxu0 %v2026_v50  ;;  %v2013_v21 = vld [vmem:[#allocation8 + $0x730] sm:$0xff]  ;;  %v2018_v50 = vld [vmem:[#allocation8 + $0x758] sm:$0xff] }
 0x196   : > { %v1079_v3 = vpop.f32.mrf.mxu2 }
 0x197   : > { %v3780_v13 = vadd.f32 %v1079_v3, %v3690_v14  ;;  %v1111_v23 = vpop.f32.mrf.mxu3  ;;  %v2016_v14 = vld [vmem:[#allocation8 + $0x748] sm:$0xff]  ;;  %2066 = vmatpush.msra.mxu1 %v2019_v15  ;;  %2162 = vmatpush.msrb.mxu0 %v2022_v0 }
 0x198   : > { %v3783_v37 = vadd.f32 %v1111_v23, %v3693_v38  ;;  %v3785_v63 = vpop.f32.mrf.mxu1  ;;  %v2017_v38 = vld [vmem:[#allocation8 + $0x750] sm:$0xff]  ;;  %2099 = vmatpush.msra.mxu2 %v2016_v14 }
 0x199   : > { %v3787_v35 = vpop.f32.mrf.mxu0  ;;  %2131 = vmatpush.msra.mxu3 %v2017_v38  ;;  %2163 = vmatpush.msrb.mxu0 %v2018_v50 }
 0x19a   : > { %2100 = vmatpush.msra.mxu2 %v2012_v53  ;;  %v2007_v53 = vld [vmem:[#allocation8 + $0x700] sm:$0xff] }
 0x19b   : > { %2815 = vmatmul.msk.f32.gmra.mxu1 %vm470_vm1, %v3391_v22  ;;  %2820 = vmatmul.msk.f32.gmra.mxu2 %vm470_vm1, %v3391_v22 }
 0x19c   : > { %2825 = vmatmul.msk.f32.gmra.mxu3 %vm470_vm1, %v3391_v22  ;;  %2830 = vmatmul.msk.f32.gmra.mxu0 %vm470_vm1, %v3391_v22 }
 0x19d   : > { %2132 = vmatpush.msra.mxu3 %v2013_v21  ;;  %v2010_v21 = vld [vmem:[#allocation8 + $0x718] sm:$0xff] }
 0x19e   : > { %v1082_v30 = vpop.f32.mrf.mxu2 }
 0x19f   : > { %v3798_v3 = vadd.f32 %v1082_v30, %v3708_v19  ;;  %v1114_v23 = vpop.f32.mrf.mxu3  ;;  %v2015_v19 = vld [vmem:[#allocation8 + $0x740] sm:$0xff]  ;;  %v2008_v30 = vld [vmem:[#allocation8 + $0x708] sm:$0xff] }
 0x1a0   : > { %v3801_v6 = vadd.f32 %v1114_v23, %v3711_v62  ;;  %v3803_v58 = vpop.f32.mrf.mxu1  ;;  %2067 = vmatpush.msra.mxu1 %v2015_v19  ;;  %v2009_v23 = vld [vmem:[#allocation8 + $0x710] sm:$0xff]  ;;  %2101 = vmatpush.msra.mxu2 %v2008_v30 }
 0x1a1   : > { %v3805_v22 = vpop.f32.mrf.mxu0  ;;  %2133 = vmatpush.msra.mxu3 %v2009_v23  ;;  %v2238_v23 = vld [vmem:[#allocation8 + $0x8c8] sm:$0xff] }
 0x1a2   : > { %2068 = vmatpush.msra.mxu1 %v2011_v52 }
 0x1a3   : > { %2831 = vmatmul.msk.f32.vlgmr.msrb.gmra.mxu1 %vm470_vm1, %v3395_v26  ;;  %2836 = vmatmul.msk.f32.vlgmr.msrb.gmra.mxu2 %vm470_vm1, %v3395_v26 }
 0x1a4   : > { %2841 = vmatmul.msk.f32.vlgmr.msrb.gmra.mxu3 %vm470_vm1, %v3395_v26  ;;  %2846 = vmatmul.msk.f32.vlgmr.msra.gmra.mxu0 %vm470_vm1, %v3395_v26  ;;  %v2014_v26 = vld [vmem:[#allocation8 + $0x738] sm:$0xff] }
 0x1a5   : > { %2164 = vmatpush.msrb.mxu0 %v2014_v26  ;;  %2069 = vmatpush.msra.mxu1 %v2007_v53  ;;  %v2241_v26 = vld [vmem:[#allocation8 + $0x8e0] sm:$0xff]  ;;  %v2244_v53 = vld [vmem:[#allocation8 + $0x8f8] sm:$0xff] }
 0x1a6   : > { %v1085_v62 = vpop.f32.mrf.mxu2 }
 0x1a7   : > { %v3816_v14 = vadd.f32 %v1085_v62, %v3726_v20  ;;  %v1117_v38 = vpop.f32.mrf.mxu3  ;;  %v2242_v20 = vld [vmem:[#allocation8 + $0x8e8] sm:$0xff]  ;;  %2165 = vmatpush.msrb.mxu0 %v2010_v21  ;;  %2268 = vmatpush.msrb.mxu1 %v2241_v26 }
 0x1a8   : > { %v3819_v15 = vadd.f32 %v1117_v38, %v3729_v4  ;;  %v3821_v0 = vpop.f32.mrf.mxu1  ;;  %v2243_v4 = vld [vmem:[#allocation8 + $0x8f0] sm:$0xff]  ;;  %2300 = vmatpush.msrb.mxu2 %v2242_v20 }
 0x1a9   : > { %4326 = vst [vmem:[#allocation25_spill] sm:$0xff] %v3821_v0  ;;  %v3823_v48 = vpop.f32.mrf.mxu0  ;;  %2332 = vmatpush.msrb.mxu3 %v2243_v4  ;;  %2364 = vmatpush.msra.mxu0 %v2244_v53 }
 0x1aa   : > { %4327 = vst [vmem:[#allocation26_spill] sm:$0xff] %v3823_v48  ;;  %2301 = vmatpush.msrb.mxu2 %v2238_v23  ;;  %v2237_v48 = vld [vmem:[#allocation8 + $0x8c0] sm:$0xff]  ;;  %v2230_v23 = vld [vmem:[#allocation8 + $0x888] sm:$0xff] }
 0x1ab   : > { %2832 = vmatmul.msk.f32.gmra.mxu1 %vm470_vm1, %v3398_v27  ;;  %2837 = vmatmul.msk.f32.gmra.mxu2 %vm470_vm1, %v3398_v27 }
 0x1ac   : > { %2842 = vmatmul.msk.f32.gmra.mxu3 %vm470_vm1, %v3398_v27  ;;  %2847 = vmatmul.msk.f32.gmra.mxu0 %vm470_vm1, %v3398_v27  ;;  %v2239_v27 = vld [vmem:[#allocation8 + $0x8d0] sm:$0xff] }
 0x1ad   : > { %2333 = vmatpush.msrb.mxu3 %v2239_v27  ;;  %2269 = vmatpush.msrb.mxu1 %v2237_v48  ;;  %v2231_v27 = vld [vmem:[#allocation8 + $0x890] sm:$0xff] }
 0x1ae   : > { %v1279_v52 = vpop.f32.mrf.mxu2 }
 0x1af   : > { %v3834_v19 = vadd.f32 %v1279_v52, %v3744_v57  ;;  %v1311_v50 = vpop.f32.mrf.mxu3  ;;  %v2234_v57 = vld [vmem:[#allocation8 + $0x8a8] sm:$0xff] }
 0x1b0   : > { %v3837_v62 = vadd.f32 %v1311_v50, %v3747_v59  ;;  %v3839_v38 = vpop.f32.mrf.mxu1  ;;  %v2235_v59 = vld [vmem:[#allocation8 + $0x8b0] sm:$0xff]  ;;  %2302 = vmatpush.msrb.mxu2 %v2234_v57 }
 0x1b1   : > { %v3841_v30 = vpop.f32.mrf.mxu0  ;;  %2334 = vmatpush.msrb.mxu3 %v2235_v59 }
 0x1b2   : > { %2303 = vmatpush.msrb.mxu2 %v2230_v23  ;;  %v2232_v23 = vld [vmem:[#allocation8 + $0x898] sm:$0xff] }
 0x1b3   : > { %2833 = vmatmul.msk.f32.gmra.mxu1 %vm470_vm1, %v3401_v28  ;;  %2838 = vmatmul.msk.f32.gmra.mxu2 %vm470_vm1, %v3401_v28 }
 0x1b4   : > { %2843 = vmatmul.msk.f32.gmra.mxu3 %vm470_vm1, %v3401_v28  ;;  %2848 = vmatmul.msk.f32.gmra.mxu0 %vm470_vm1, %v3401_v28  ;;  %v2240_v28 = vld [vmem:[#allocation8 + $0x8d8] sm:$0xff] }
 0x1b5   : > { %2365 = vmatpush.msra.mxu0 %v2240_v28  ;;  %2335 = vmatpush.msrb.mxu3 %v2231_v27  ;;  %v2225_v27 = vld [vmem:[#allocation8 + $0x860] sm:$0xff] }
 0x1b6   : > { %v1282_v21 = vpop.f32.mrf.mxu2 }
 0x1b7   : > { %v3852_v20 = vadd.f32 %v1282_v21, %v3762_v11  ;;  %v1314_v4 = vpop.f32.mrf.mxu3  ;;  %v2233_v11 = vld [vmem:[#allocation8 + $0x8a0] sm:$0xff]  ;;  %v2226_v21 = vld [vmem:[#allocation8 + $0x868] sm:$0xff] }
 0x1b8   : > { %v3855_v52 = vadd.f32 %v1314_v4, %v3765_v18  ;;  %v3857_v50 = vpop.f32.mrf.mxu1  ;;  %v2236_v18 = vld [vmem:[#allocation8 + $0x8b8] sm:$0xff]  ;;  %2270 = vmatpush.msrb.mxu1 %v2233_v11  ;;  %v2227_v4 = vld [vmem:[#allocation8 + $0x870] sm:$0xff]  ;;  %2304 = vmatpush.msrb.mxu2 %v2226_v21 }
 0x1b9   : > { %v3859_v0 = vpop.f32.mrf.mxu0  ;;  %2366 = vmatpush.msra.mxu0 %v2236_v18  ;;  %2336 = vmatpush.msrb.mxu3 %v2227_v4  ;;  %v2228_v11 = vld [vmem:[#allocation8 + $0x878] sm:$0xff] }
 0x1bb   : > { %2834 = vmatmul.msk.f32.gmra.mxu1 %vm470_vm1, %v3405_v33  ;;  %2839 = vmatmul.msk.f32.gmra.mxu2 %vm470_vm1, %v3405_v33 }
 0x1bc   : > { %2844 = vmatmul.msk.f32.gmra.mxu3 %vm470_vm1, %v3405_v33  ;;  %2849 = vmatmul.msk.f32.gmra.mxu0 %vm470_vm1, %v3405_v33  ;;  %v2229_v33 = vld [vmem:[#allocation8 + $0x880] sm:$0xff] }
 0x1bd   : > { %2271 = vmatpush.msrb.mxu1 %v2229_v33  ;;  %2367 = vmatpush.msra.mxu0 %v2232_v23  ;;  %v2219_v33 = vld [vmem:[#allocation8 + $0x830] sm:$0xff]  ;;  %v2224_v23 = vld [vmem:[#allocation8 + $0x858] sm:$0xff] }
 0x1be   : > { %v1285_v48 = vpop.f32.mrf.mxu2 }
 0x1bf   : > { %v3870_v26 = vadd.f32 %v1285_v48, %v3780_v13  ;;  %v1317_v53 = vpop.f32.mrf.mxu3  ;;  %v2222_v13 = vld [vmem:[#allocation8 + $0x848] sm:$0xff]  ;;  %2272 = vmatpush.msrb.mxu1 %v2225_v27  ;;  %2368 = vmatpush.msra.mxu0 %v2228_v11 }
 0x1c0   : > { %v3873_v57 = vadd.f32 %v1317_v53, %v3783_v37  ;;  %v3875_v59 = vpop.f32.mrf.mxu1  ;;  %v2223_v37 = vld [vmem:[#allocation8 + $0x850] sm:$0xff]  ;;  %2305 = vmatpush.msrb.mxu2 %v2222_v13 }
 0x1c1   : > { %v3877_v28 = vpop.f32.mrf.mxu0  ;;  %2337 = vmatpush.msrb.mxu3 %v2223_v37  ;;  %2369 = vmatpush.msra.mxu0 %v2224_v23 }
 0x1c2   : > { %2306 = vmatpush.msrb.mxu2 %v2218_v51  ;;  %v2213_v51 = vld [vmem:[#allocation8 + $0x800] sm:$0xff] }
 0x1c3   : > { %2835 = vmatmul.msk.f32.gmra.mxu1 %vm470_vm1, %v3408_v34  ;;  %2840 = vmatmul.msk.f32.gmra.mxu2 %vm470_vm1, %v3408_v34 }
 0x1c4   : > { %2845 = vmatmul.msk.f32.gmra.mxu3 %vm470_vm1, %v3408_v34  ;;  %2850 = vmatmul.msk.f32.gmra.mxu0 %vm470_vm1, %v3408_v34 }
 0x1c5   : > { %2338 = vmatpush.msrb.mxu3 %v2219_v33  ;;  %v2216_v33 = vld [vmem:[#allocation8 + $0x818] sm:$0xff] }
 0x1c6   : > { %v1288_v18 = vpop.f32.mrf.mxu2 }
 0x1c7   : > { %v3888_v48 = vadd.f32 %v1288_v18, %v3798_v3  ;;  %v1320_v53 = vpop.f32.mrf.mxu3  ;;  %v2221_v3 = vld [vmem:[#allocation8 + $0x840] sm:$0xff]  ;;  %v2214_v18 = vld [vmem:[#allocation8 + $0x808] sm:$0xff] }
 0x1c8   : > { %v3891_v21 = vadd.f32 %v1320_v53, %v3801_v6  ;;  %v3893_v4 = vpop.f32.mrf.mxu1  ;;  %2273 = vmatpush.msrb.mxu1 %v2221_v3  ;;  %v2215_v53 = vld [vmem:[#allocation8 + $0x810] sm:$0xff]  ;;  %2307 = vmatpush.msrb.mxu2 %v2214_v18 }
 0x1c9   : > { %v3895_v34 = vpop.f32.mrf.mxu0  ;;  %2339 = vmatpush.msrb.mxu3 %v2215_v53 }
 0x1ca   : > { %2274 = vmatpush.msrb.mxu1 %v2217_v47 }
 0x1cb   : > { %2851 = vmatmul.msk.f32.vlgmr.msra.gmra.mxu1 %vm470_vm1, %v3411_v36  ;;  %2856 = vmatmul.msk.f32.vlgmr.msra.gmra.mxu2 %vm470_vm1, %v3411_v36 }
 0x1cc   : > { %2861 = vmatmul.msk.f32.vlgmr.msra.gmra.mxu3 %vm470_vm1, %v3411_v36  ;;  %2866 = vmatmul.msk.f32.vlgmr.msrb.gmra.mxu0 %vm470_vm1, %v3411_v36  ;;  %v2220_v36 = vld [vmem:[#allocation8 + $0x838] sm:$0xff] }
 0x1cd   : > { %2370 = vmatpush.msra.mxu0 %v2220_v36  ;;  %2275 = vmatpush.msrb.mxu1 %v2213_v51  ;;  %v3974_v36 = vstv %s2432_s23  ;;  %v865_v51 = vadd.f32 %v3695_v45, %v3609_v24  ;;  %v3153_v24 = vmov 0  }
 0x1ce   : > { %v1291_v6 = vpop.f32.mrf.mxu2  ;;  %2963 = vset.pattern.permute.xlu0 %v3153_v24  ;;  %2964 = vset.pattern.permute.xlu1 %v3153_v24 }
 0x1cf   : > { %v3906_v13 = vadd.f32 %v1291_v6, %v3816_v14  ;;  %v1323_v37 = vpop.f32.mrf.mxu3  ;;  %v859_v14 = vadd.f32 %v3659_v2, %v3577_v39  ;;  %2371 = vmatpush.msra.mxu0 %v2216_v33  ;;  %v1164_v33 = vadd.f32 %v3785_v63, %v865_v51  ;;  %2965 = vset.pattern.permute.xlu2 %v3153_v24  ;;  %v2436_v24 = vld [vmem:[%s3963_s27 + $0x18] sm:$0xff] }
 0x1d0   : > { %v3909_v27 = vadd.f32 %v1323_v37, %v3819_v15  ;;  %v3911_v11 = vpop.f32.mrf.mxu1  ;;  %v955_v15 = vadd.f32 %v3661_v10, %v3579_v55 }
 0x1d1   : > { %v3913_v7 = vpop.f32.mrf.mxu0  ;;  %v1156_v47 = vadd.f32 %v3749_v43, %v859_v14 }
 0x1d2   : > { %v1159_v39 = vadd.f32 %v3751_v8, %v955_v15  ;;  %v862_v8 = vadd.f32 %v3677_v49, %v3593_v9  ;;  %v1370_v15 = vadd.f32 %v3875_v59, %v1164_v33 }
 0x1d3   : > { %2852 = vmatmul.msk.f32.gmra.mxu1 %vm470_vm1, %v3415_v40  ;;  %2857 = vmatmul.msk.f32.gmra.mxu2 %vm470_vm1, %v3415_v40  ;;  %v1362_v3 = vadd.f32 %v3839_v38, %v1156_v47 }
 0x1d4   : > { %2862 = vmatmul.msk.f32.gmra.mxu3 %vm470_vm1, %v3415_v40  ;;  %2867 = vmatmul.msk.f32.gmra.mxu0 %vm470_vm1, %v3415_v40  ;;  %v1365_v10 = vadd.f32 %v3841_v30, %v1159_v39 }
 0x1d6   : > { %v1485_v2 = vpop.f32.mrf.mxu2 }
 0x1d7   : > { %v3931_v23 = vadd.f32 %v1485_v2, %v3834_v19  ;;  %v1517_v55 = vpop.f32.mrf.mxu3  ;;  %v958_v19 = vadd.f32 %v3679_v1, %v3595_v16 }
 0x1d8   : > { %v3935_v6 = vadd.f32 %v1517_v55, %v3837_v62  ;;  %v1456_v40 = vpop.f32.mrf.mxu1  ;;  %v1160_v62 = vadd.f32 %v3767_v32, %v862_v8  ;;  %v868_v55 = vadd.f32 %v3713_v31, %v3625_v60  ;;  %v952_v8 = vadd.f32 %v3643_v44, %v3563_v56  ;;  %v4331_v56 = vld [vmem:[#allocation25_spill] sm:$0xff] }
 0x1d9   : > { %v3937_v37 = vadd.f32 %v1456_v40, %v1362_v3  ;;  %v1552_v43 = vpop.f32.mrf.mxu0  ;;  %v1163_v9 = vadd.f32 %v3769_v54, %v958_v19  ;;  %v4328_v19 = vld [vmem:[#allocation23_spill] sm:$0xff] }
 0x1da   : > { %v3939_v18 = vadd.f32 %v1552_v43, %v1365_v10  ;;  %v1366_v38 = vadd.f32 %v3857_v50, %v1160_v62  ;;  %v1168_v60 = vadd.f32 %v3803_v58, %v868_v55 }
 0x1db   : > { %2853 = vmatmul.msk.f32.gmra.mxu1 %vm470_vm1, %v3418_v41  ;;  %2858 = vmatmul.msk.f32.gmra.mxu2 %vm470_vm1, %v3418_v41  ;;  %v1369_v16 = vadd.f32 %v3859_v0, %v1163_v9  ;;  %v4329_v9 = vld [vmem:[#allocation14_spill] sm:$0xff] }
 0x1dc   : > { %2863 = vmatmul.msk.f32.gmra.mxu3 %vm470_vm1, %v3418_v41  ;;  %2868 = vmatmul.msk.f32.gmra.mxu0 %vm470_vm1, %v3418_v41 }
 0x1de   : > { %v1488_v49 = vpop.f32.mrf.mxu2 }
 0x1df   : > { %v3958_v30 = vadd.f32 %v1488_v49, %v3852_v20  ;;  %v1520_v53 = vpop.f32.mrf.mxu3  ;;  %v2433_v20 = vld [vmem:[%s3963_s27] sm:$0xff] }
 0x1e0   : > { %v3967_v41 = vadd.f32 %v1520_v53, %v3855_v52  ;;  %v1459_v1 = vpop.f32.mrf.mxu1  ;;  %v2439_v0 = vmul.f32 %v3974_v36, %v2433_v20  ;;  %v961_v52 = vadd.f32 %v3697_v5, %v3611_v29 }
 0x1e1   : > { %v3969_v54 = vadd.f32 %v1459_v1, %v1366_v38  ;;  %v1555_v32 = vpop.f32.mrf.mxu0 }
 0x1e2   : > { %v3971_v50 = vadd.f32 %v1555_v32, %v1369_v16  ;;  %v1167_v45 = vadd.f32 %v3787_v35, %v961_v52  ;;  %2446 = vperm.xlu0 %2963, %v2439_v0   ;;  %v2434_v35 = vld [vmem:[%s3963_s27 + $0x8] sm:$0xff] }
 0x1e3   : > { %2854 = vmatmul.msk.f32.gmra.mxu1 %vm470_vm1, %v3421_v42  ;;  %2859 = vmatmul.msk.f32.gmra.mxu2 %vm470_vm1, %v3421_v42 }
 0x1e4   : > { %2864 = vmatmul.msk.f32.gmra.mxu3 %vm470_vm1, %v3421_v42  ;;  %2869 = vmatmul.msk.f32.gmra.mxu0 %vm470_vm1, %v3421_v42  ;;  %v1373_v47 = vadd.f32 %v3877_v28, %v1167_v45  ;;  %v1374_v28 = vadd.f32 %v3893_v4, %v1168_v60  ;;  %v4333_v45 = vld [vmem:[#allocation15_spill] sm:$0xff]  ;;  %v4335_v60 = vld [vmem:[#allocation17_spill] sm:$0xff] }
 0x1e6   : > { %v1491_v14 = vpop.f32.mrf.mxu2 }
 0x1e7   : > { %v3993_v29 = vadd.f32 %v1491_v14, %v3870_v26  ;;  %v1523_v5 = vpop.f32.mrf.mxu3  ;;  %v2440_v26 = vmul.f32 %v3974_v36, %v2434_v35 }
 0x1e8   : > { %v3997_v42 = vadd.f32 %v1523_v5, %v3873_v57  ;;  %v1462_v63 = vpop.f32.mrf.mxu1  ;;  %v964_v57 = vadd.f32 %v3715_v12, %v3627_v61 }
 0x1e9   : > { %v3999_v39 = vadd.f32 %v1462_v63, %v1370_v15  ;;  %v1558_v2 = vpop.f32.mrf.mxu0 }
 0x1ea   : > { %v4001_v3 = vadd.f32 %v1558_v2, %v1373_v47  ;;  %v1171_v31 = vadd.f32 %v3805_v22, %v964_v57  ;;  %2451 = vperm.xlu0 %2963, %v2440_v26   ;;  %v4334_v2 = vld [vmem:[#allocation16_spill] sm:$0xff] }
 0x1eb   : > { %2855 = vmatmul.msk.f32.gmra.mxu1 %vm470_vm1, %v3424_v46  ;;  %2860 = vmatmul.msk.f32.gmra.mxu2 %vm470_vm1, %v3424_v46 }
 0x1ec   : > { %2865 = vmatmul.msk.f32.gmra.mxu3 %vm470_vm1, %v3424_v46  ;;  %2870 = vmatmul.msk.f32.gmra.mxu0 %vm470_vm1, %v3424_v46  ;;  %v1377_v61 = vadd.f32 %v3895_v34, %v1171_v31  ;;  %v856_v46 = vadd.f32 %v3641_v17, %v3561_v25  ;;  %v4330_v25 = vld [vmem:[#allocation24_spill] sm:$0xff]  ;;  %v4332_v34 = vld [vmem:[#allocation26_spill] sm:$0xff] }
 0x1ed   : > { %v1155_v17 = vadd.f32 %v4330_v25, %v952_v8 }
 0x1ee   : > { %v1494_v59 = vpop.f32.mrf.mxu2  ;;  %v1152_v62 = vadd.f32 %v4328_v19, %v856_v46 }
 0x1ef   : > { %v4021_v10 = vadd.f32 %v1494_v59, %v3888_v48  ;;  %v1526_v40 = vpop.f32.mrf.mxu3  ;;  %v2435_v48 = vld [vmem:[%s3963_s27 + $0x10] sm:$0xff]  ;;  %v1361_v49 = vadd.f32 %v4332_v34, %v1155_v17 }
 0x1f0   : > { %v4025_v12 = vadd.f32 %v1526_v40, %v3891_v21  ;;  %v1465_v43 = vpop.f32.mrf.mxu1  ;;  %v2441_v21 = vmul.f32 %v3974_v36, %v2435_v48  ;;  %v1358_v44 = vadd.f32 %v4331_v56, %v1152_v62  ;;  %v2437_v48 = vld [vmem:[%s3963_s27 + $0x20] sm:$0xf] }
 0x1f1   : > { %v4029_v58 = vadd.f32 %v1465_v43, %v1374_v28  ;;  %v1561_v22 = vpop.f32.mrf.mxu0  ;;  %v1567_v32 = vadd.f32 %v3913_v7, %v1361_v49  ;;  %v2443_v19 = vmul.f32 %v3974_v36, %v2437_v48 }
 0x1f2   : > { %v4033_v4 = vadd.f32 %v1561_v22, %v1377_v61  ;;  %2456 = vperm.xlu1 %2964, %v2441_v21   ;;  %v1564_v53 = vadd.f32 %v3911_v11, %v1358_v44  ;;  %v2442_v11 = vmul.f32 %v3974_v36, %v2436_v24  ;;  %v4336_v61 = vld [vmem:[#allocation18_spill] sm:$0xff] }
 0x1f3   : > { %2871 = vmatmul.msk.f32.vlgmr.msrb.gmra.mxu1 %vm470_vm1, %v4329_v9  ;;  %2876 = vmatmul.msk.f32.vlgmr.msrb.gmra.mxu2 %vm470_vm1, %v4329_v9 }
 0x1f4   : > { %2881 = vmatmul.msk.f32.vlgmr.msrb.gmra.mxu3 %vm470_vm1, %v4329_v9  ;;  %2886 = vmatmul.msk.f32.vlgmr.msra.gmra.mxu0 %vm470_vm1, %v4329_v9 }
 0x1f5   : > { %2466 = vperm.xlu2 %2965, %v2443_v19  }
 0x1f6   : > { %v1497_v38 = vpop.f32.mrf.mxu2 }
 0x1f7   : > { %v4051_v16 = vadd.f32 %v1497_v38, %v3906_v13  ;;  %v1529_v1 = vpop.f32.mrf.mxu3 }
 0x1f8   : > { %v1582_v20 = vadd.f32 %v1529_v1, %v3909_v27  ;;  %v1659_v51 = vpop.f32.mrf.mxu1 }
 0x1f9   : > { %v1770_v0 = vadd.f32 %v1659_v51, %v1564_v53  ;;  %v1755_v52 = vpop.f32.mrf.mxu0 }
 0x1fa   : > { %v1773_v33 = vadd.f32 %v1755_v52, %v1567_v32  ;;  %2461 = vperm.xlu1 %2964, %v2442_v11  }
 0x1fb   : > { %2872 = vmatmul.msk.f32.gmra.mxu1 %vm470_vm1, %v4333_v45  ;;  %2877 = vmatmul.msk.f32.gmra.mxu2 %vm470_vm1, %v4333_v45 }
 0x1fc   : > { %2882 = vmatmul.msk.f32.gmra.mxu3 %vm470_vm1, %v4333_v45  ;;  %2887 = vmatmul.msk.f32.gmra.mxu0 %vm470_vm1, %v4333_v45 }
 0x1fe   : > { %v1691_v7 = vpop.f32.mrf.mxu2 }
 0x1ff   : > { %v1771_v13 = vadd.f32 %v1691_v7, %v3931_v23  ;;  %v1723_v27 = vpop.f32.mrf.mxu3 }
 0x200   : > { %v1772_v14 = vadd.f32 %v1723_v27, %v3935_v6  ;;  %v1662_v15 = vpop.f32.mrf.mxu1 }
 0x201   : > { %v1774_v5 = vadd.f32 %v1662_v15, %v3937_v37  ;;  %v1758_v47 = vpop.f32.mrf.mxu0 }
 0x202   : > { %v1777_v63 = vadd.f32 %v1758_v47, %v3939_v18 }
 0x203   : > { %2873 = vmatmul.msk.f32.gmra.mxu1 %vm470_vm1, %v4334_v2  ;;  %2878 = vmatmul.msk.f32.gmra.mxu2 %vm470_vm1, %v4334_v2 }
 0x204   : > { %2883 = vmatmul.msk.f32.gmra.mxu3 %vm470_vm1, %v4334_v2  ;;  %2888 = vmatmul.msk.f32.gmra.mxu0 %vm470_vm1, %v4334_v2 }
 0x206   : > { %v1694_v23 = vpop.f32.mrf.mxu2 }
 0x207   : > { %v1775_v6 = vadd.f32 %v1694_v23, %v3958_v30  ;;  %v1726_v35 = vpop.f32.mrf.mxu3 }
 0x208   : > { %v1776_v37 = vadd.f32 %v1726_v35, %v3967_v41  ;;  %v1665_v55 = vpop.f32.mrf.mxu1 }
 0x209   : > { %v1778_v18 = vadd.f32 %v1665_v55, %v3969_v54  ;;  %v1761_v26 = vpop.f32.mrf.mxu0 }
 0x20a   : > { %v1781_v57 = vadd.f32 %v1761_v26, %v3971_v50 }
 0x20b   : > { %2874 = vmatmul.msk.f32.gmra.mxu1 %vm470_vm1, %v4335_v60  ;;  %2879 = vmatmul.msk.f32.gmra.mxu2 %vm470_vm1, %v4335_v60 }
 0x20c   : > { %2884 = vmatmul.msk.f32.gmra.mxu3 %vm470_vm1, %v4335_v60  ;;  %2889 = vmatmul.msk.f32.gmra.mxu0 %vm470_vm1, %v4335_v60 }
 0x20e   : > { %v1697_v30 = vpop.f32.mrf.mxu2 }
 0x20f   : > { %v1779_v41 = vadd.f32 %v1697_v30, %v3993_v29  ;;  %v1729_v31 = vpop.f32.mrf.mxu3 }
 0x210   : > { %v1780_v54 = vadd.f32 %v1729_v31, %v3997_v42  ;;  %v1668_v59 = vpop.f32.mrf.mxu1 }
 0x211   : > { %v1782_v50 = vadd.f32 %v1668_v59, %v3999_v39  ;;  %v1764_v28 = vpop.f32.mrf.mxu0 }
 0x212   : > { %v1785_v40 = vadd.f32 %v1764_v28, %v4001_v3 }
 0x213   : > { %2875 = vmatmul.msk.f32.gmra.mxu1 %vm470_vm1, %v4336_v61  ;;  %2880 = vmatmul.msk.f32.gmra.mxu2 %vm470_vm1, %v4336_v61 }
 0x214   : > { %2885 = vmatmul.msk.f32.gmra.mxu3 %vm470_vm1, %v4336_v61  ;;  %2890 = vmatmul.msk.f32.gmra.mxu0 %vm470_vm1, %v4336_v61  ;;  %v4339_v61 = vld [vmem:[#allocation21_spill] sm:$0xff] }
 0x216   : > { %v1700_v29 = vpop.f32.mrf.mxu2 }
 0x217   : > { %v1783_v42 = vadd.f32 %v1700_v29, %v4021_v10  ;;  %v1732_v43 = vpop.f32.mrf.mxu3  ;;  %v512_v29 = vadd.f32 1e-08, %v4339_v61 }
 0x218   : > { %v1784_v39 = vadd.f32 %v1732_v43, %v4025_v12  ;;  %v1671_v46 = vpop.f32.mrf.mxu1  ;;  %v4340_v43 = vld [vmem:[#allocation22_spill] sm:$0xff] }
 0x219   : > { %v1786_v3 = vadd.f32 %v1671_v46, %v4029_v58  ;;  %v1767_v22 = vpop.f32.mrf.mxu0  ;;  %vm570_vm10 = vweird.f32 %v512_v29 }
 0x21a   : > { %v1789_v8 = vadd.f32 %v1767_v22, %v4033_v4 }
 0x21e   : > { %v1703_v62 = vpop.f32.mrf.mxu2 }
 0x21f   : > { %v1787_v9 = vadd.f32 %v1703_v62, %v4051_v16  ;;  %v1735_v21 = vpop.f32.mrf.mxu3 }
 0x220   : > { %v1788_v25 = vadd.f32 %v1735_v21, %v1582_v20  ;;  %v1865_v17 = vpop.f32.mrf.mxu1 }
 0x221   : > { %v4108_v10 = vadd.f32 %v1865_v17, %v1770_v0  ;;  %v1961_v56 = vpop.f32.mrf.mxu0 }
 0x222   : > { %v4110_v12 = vadd.f32 %v1961_v56, %v1773_v33 }
 0x226   : > { %v1897_v44 = vpop.f32.mrf.mxu2 }
 0x227   : > { %v4112_v58 = vadd.f32 %v1897_v44, %v1771_v13  ;;  %v1929_v34 = vpop.f32.mrf.mxu3 }
 0x228   : > { %v4114_v4 = vadd.f32 %v1929_v34, %v1772_v14  ;;  %v1868_v49 = vpop.f32.mrf.mxu1 }
 0x229   : > { %v4116_v36 = vadd.f32 %v1868_v49, %v1774_v5  ;;  %v1964_v38 = vpop.f32.mrf.mxu0 }
 0x22a   : > { %v4118_v53 = vadd.f32 %v1964_v38, %v1777_v63 }
 0x22e   : > { %v1900_v16 = vpop.f32.mrf.mxu2 }
 0x22f   : > { %v4120_v1 = vadd.f32 %v1900_v16, %v1775_v6  ;;  %v1932_v32 = vpop.f32.mrf.mxu3 }
 0x230   : > { %v4122_v20 = vadd.f32 %v1932_v32, %v1776_v37  ;;  %v1871_v51 = vpop.f32.mrf.mxu1 }
 0x231   : > { %v4124_v0 = vadd.f32 %v1871_v51, %v1778_v18  ;;  %v1967_v52 = vpop.f32.mrf.mxu0 }
 0x232   : > { %v4126_v33 = vadd.f32 %v1967_v52, %v1781_v57 }
 0x236   : > { %v1903_v24 = vpop.f32.mrf.mxu2 }
 0x237   : > { %v4128_v45 = vadd.f32 %v1903_v24, %v1779_v41  ;;  %v1935_v11 = vpop.f32.mrf.mxu3  ;;  %v4337_v41 = vld [vmem:[#allocation19_spill] sm:$0xff] }
 0x238   : > { %v4130_v7 = vadd.f32 %v1935_v11, %v1780_v54  ;;  %v1874_v13 = vpop.f32.mrf.mxu1  ;;  %v492_v31 = vadd.f32 1e-08, %v4337_v41  ;;  %v4338_v54 = vld [vmem:[#allocation20_spill] sm:$0xff] }
 0x239   : > { %v4132_v27 = vadd.f32 %v1874_v13, %v1782_v50  ;;  %v1970_v14 = vpop.f32.mrf.mxu0  ;;  %v552_v59 = vadd.f32 1e-08, %v4338_v54 }
 0x23a   : > { %v4134_v15 = vadd.f32 %v1970_v14, %v1785_v40  ;;  %2966 = vrsqrt.f32 %v492_v31  ;;  %vm560_vm4 = vweird.f32 %v492_v31 }
 0x23b   : > { %2968 = vrsqrt.f32 %v552_v59  ;;  %vm590_vm6 = vweird.f32 %v552_v59 }
 0x23c   : > { %2970 = vrsqrt.f32 %v512_v29 }
 0x23e   : > { %v1906_v5 = vpop.f32.mrf.mxu2 }
 0x23f   : > { %v4136_v47 = vadd.f32 %v1906_v5, %v1783_v42  ;;  %v1938_v63 = vpop.f32.mrf.mxu3 }
 0x240   : > { %v4138_v2 = vadd.f32 %v1938_v63, %v1784_v39  ;;  %v1877_v23 = vpop.f32.mrf.mxu1  ;;  %v532_v39 = vadd.f32 1e-08, %v4340_v43 }
 0x241   : > { %v4140_v6 = vadd.f32 %v1877_v23, %v1786_v3  ;;  %v1973_v35 = vpop.f32.mrf.mxu0  ;;  %v2967_v3 = vpop.eup %2966 }
 0x242   : > { %v4142_v37 = vadd.f32 %v1973_v35, %v1789_v8  ;;  %2972 = vrsqrt.f32 %v532_v39  ;;  %v2969_v8 = vpop.eup %2968  ;;  %v555_v62 = vmul.f32 %v2967_v3, %v492_v31  ;;  %vm561_vm2 = vweird.f32 %v2967_v3 }
 0x243   : > { %v585_v21 = vmul.f32 %v2969_v8, %v552_v59  ;;  %vm591_vm3 = vweird.f32 %v2969_v8  ;;  %vm4186_vm5 = vmor %vm560_vm4, %vm561_vm2  ;;  %vm580_vm12 = vweird.f32 %v532_v39 }
 0x244   : > { %v556_v17 = vmul.f32 %v2967_v3, %v555_v62  ;;  %vm4192_vm7 = vmor %vm590_vm6, %vm591_vm3 }
 0x245   : > { %v586_v44 = vmul.f32 %v2969_v8, %v585_v21 }
 0x246   : > { %v1909_v55 = vpop.f32.mrf.mxu2  ;;  %v557_v51 = vmul.f32 0.5, %v556_v17 }
 0x247   : > { %v4144_v18 = vadd.f32 %v1909_v55, %v1787_v9  ;;  %v1941_v26 = vpop.f32.mrf.mxu3  ;;  %v2971_v9 = vpop.eup %2970  ;;  %v587_v52 = vmul.f32 0.5, %v586_v44 }
 0x248   : > { %v4146_v57 = vadd.f32 %v1941_v26, %v1788_v25  ;;  %v2071_v60 = vpop.f32.mrf.mxu1  ;;  %v2973_v25 = vpop.eup %2972  ;;  %v565_v34 = vmul.f32 %v2971_v9, %v512_v29  ;;  %v558_v13 = vsub.f32 1.5, %v557_v51  ;;  %vm571_vm8 = vweird.f32 %v2971_v9 }
 0x249   : > { %v4148_v30 = vpop.f32.mrf.mxu0  ;;  %v575_v49 = vmul.f32 %v2973_v25, %v532_v39  ;;  %v588_v5 = vsub.f32 1.5, %v587_v52  ;;  %vm581_vm9 = vweird.f32 %v2973_v25  ;;  %v2182_v51 = vadd.f32 %v2071_v60, %v4108_v10  ;;  %vm572_vm11 = vmor %vm570_vm10, %vm571_vm8 }
 0x24a   : > { %v566_v24 = vmul.f32 %v2971_v9, %v565_v34  ;;  %v559_v41 = vmul.f32 %v2967_v3, %v558_v13  ;;  %v2185_v59 = vadd.f32 %v4148_v30, %v4110_v12  ;;  %vm582_vm13 = vmor %vm580_vm12, %vm581_vm9 }
 0x24b   : > { %v576_v11 = vmul.f32 %v2973_v25, %v575_v49  ;;  %v589_v54 = vmul.f32 %v2969_v8, %v588_v5 }
 0x24c   : > { %v567_v63 = vmul.f32 0.5, %v566_v24  ;;  %v563_v21 = vsel %vm4186_vm5, %v2967_v3, %v559_v41 }
 0x24d   : > { %v577_v23 = vmul.f32 0.5, %v576_v11  ;;  %v593_v34 = vsel %vm4192_vm7, %v2969_v8, %v589_v54  ;;  %v4205_v11 = vperm.slane %v563_v21, 0 }
 0x24e   : > { %v4152_v50 = vpop.f32.mrf.mxu2  ;;  %v568_v61 = vsub.f32 1.5, %v567_v63  ;;  %v4207_v8 = vperm.slane %v593_v34, 0 }
 0x24f   : > { %v4154_v28 = vpop.f32.mrf.mxu3  ;;  %v578_v43 = vsub.f32 1.5, %v577_v23  ;;  %v2183_v30 = vadd.f32 %v4152_v50, %v4112_v58 }
 0x250   : > { %v4156_v40 = vpop.f32.mrf.mxu1  ;;  %v569_v31 = vmul.f32 %v2971_v9, %v568_v61  ;;  %v2184_v54 = vadd.f32 %v4154_v28, %v4114_v4 }
 0x251   : > { %v4159_v42 = vpop.f32.mrf.mxu0  ;;  %v579_v49 = vmul.f32 %v2973_v25, %v578_v43 }
 0x252   : > { %v573_v60 = vsel %vm572_vm11, %v2971_v9, %v569_v31  ;;  %v2186_v9 = vadd.f32 %v4156_v40, %v4116_v36  ;;  %v2189_v62 = vadd.f32 %v4159_v42, %v4118_v53 }
 0x253   : > { %v583_v63 = vsel %vm582_vm13, %v2973_v25, %v579_v49  ;;  %v4215_v41 = vperm.slane %v573_v60, 0 }
 0x254   : > { %v2447_v24 = vpop.permute.xlu0 %2446  ;;  %v4217_v39 = vperm.slane %v583_v63, 0 }
 0x256   : > { %v4162_v46 = vpop.f32.mrf.mxu2 }
 0x257   : > { %v4164_v22 = vpop.f32.mrf.mxu3  ;;  %v2187_v53 = vadd.f32 %v4162_v46, %v4120_v1 }
 0x258   : > { %v4166_v48 = vpop.f32.mrf.mxu1  ;;  %v2188_v42 = vadd.f32 %v4164_v22, %v4122_v20 }
 0x259   : > { %v4168_v19 = vpop.f32.mrf.mxu0  ;;  %v2190_v60 = vadd.f32 %v4166_v48, %v4124_v0 }
 0x25e   : > { %v4170_v56 = vpop.f32.mrf.mxu2 }
 0x25f   : > { %v4172_v38 = vpop.f32.mrf.mxu3 }
 0x260   : > { %v4174_v16 = vpop.f32.mrf.mxu1 }
 0x261   : > { %v4176_v32 = vpop.f32.mrf.mxu0 }
 0x266   : > { %v4178_v14 = vpop.f32.mrf.mxu2 }
 0x267   : > { %v4180_v35 = vpop.f32.mrf.mxu3 }
 0x268   : > { %v4182_v55 = vpop.f32.mrf.mxu1 }
 0x269   : > { %v4184_v26 = vpop.f32.mrf.mxu0 }
 0x26e   : > { %v4196_v44 = vpop.f32.mrf.mxu2 }
 0x26f   : > { %v4201_v52 = vpop.f32.mrf.mxu3 }
 0x270   : > { %v2277_v3 = vpop.f32.mrf.mxu1 }
 0x271   : > { %v2388_v13 = vadd.f32 %v2277_v3, %v2182_v51  ;;  %v2373_v5 = vpop.f32.mrf.mxu0 }
 0x272   : > { %v2391_v10 = vadd.f32 %v2373_v5, %v2185_v59  ;;  %v2452_v59 = vpop.permute.xlu0 %2451 }
 0x273   : > { %v2412_v29 = vmul.f32 %v4205_v11, %v2388_v13 }
 0x274   : > { %v2415_v12 = vmul.f32 %v4207_v8, %v2391_v10 }
 0x275   : > { %v2469_v23 = vadd.f32 %v2447_v24, %v2412_v29 }
 0x276   : > { %v2472_v61 = vadd.f32 %v2447_v24, %v2415_v12  ;;  %v2309_v43 = vpop.f32.mrf.mxu2  ;;  %v2193_v12 = vadd.f32 %v4168_v19, %v4126_v33 }
 0x277   : > { %vm2489_vm14 = vcmp.ge.f32.partialorder %v2469_v23, 0.0  ;;  %v2509_v58 = vmul.f32 0.2, %v2469_v23  ;;  %v2389_v50 = vadd.f32 %v2309_v43, %v2183_v30  ;;  %v2341_v25 = vpop.f32.mrf.mxu3  ;;  %v2457_v43 = vpop.permute.xlu1 %2456 }
 0x278   : > { %vm2492_vm15 = vcmp.ge.f32.partialorder %v2472_v61, 0.0  ;;  %v2512_v4 = vmul.f32 0.2, %v2472_v61  ;;  %v2390_v28 = vadd.f32 %v2341_v25, %v2184_v54  ;;  %v2280_v21 = vpop.f32.mrf.mxu1 }
 0x279   : > { %v2529_v17 = vsel %vm2489_vm14, %v2469_v23, %v2509_v58  ;;  %v2413_v36 = vmul.f32 %v4215_v41, %v2389_v50  ;;  %v2392_v40 = vadd.f32 %v2280_v21, %v2186_v9  ;;  %v2376_v34 = vpop.f32.mrf.mxu0  ;;  %v2191_v21 = vadd.f32 %v4170_v56, %v4128_v45 }
 0x27a   : > { %v2532_v31 = vsel %vm2492_vm15, %v2472_v61, %v2512_v4  ;;  %2549 = vst [vmem:[%s4226_s9] sm:$0xff] %v2529_v17  ;;  %v2414_v49 = vmul.f32 %v4217_v39, %v2390_v28  ;;  %v2395_v51 = vadd.f32 %v2376_v34, %v2189_v62  ;;  %v2192_v17 = vadd.f32 %v4172_v38, %v4130_v7 }
 0x27b   : > { %2552 = vst [vmem:[%s4226_s9 + $0x18] sm:$0xff] %v2532_v31  ;;  %v2470_v3 = vadd.f32 %v2447_v24, %v2413_v36  ;;  %v2416_v13 = vmul.f32 %v4205_v11, %v2392_v40  ;;  %v2194_v34 = vadd.f32 %v4174_v16, %v4132_v27 }
 0x27c   : > { %v2471_v5 = vadd.f32 %v2447_v24, %v2414_v49  ;;  %v2419_v10 = vmul.f32 %v4207_v8, %v2395_v51  ;;  %v2197_v51 = vadd.f32 %v4176_v32, %v4134_v15 }
 0x27d   : > { %vm2490_vm0 = vcmp.ge.f32.partialorder %v2470_v3, 0.0  ;;  %v2510_v63 = vmul.f32 0.2, %v2470_v3  ;;  %v2473_v29 = vadd.f32 %v2452_v59, %v2416_v13 }
 0x27e   : > { %vm2491_vm1 = vcmp.ge.f32.partialorder %v2471_v5, 0.0  ;;  %v2511_v30 = vmul.f32 0.2, %v2471_v5  ;;  %v2476_v1 = vadd.f32 %v2452_v59, %v2419_v10  ;;  %v2312_v46 = vpop.f32.mrf.mxu2 }
 0x27f   : > { %v2530_v23 = vsel %vm2490_vm0, %v2470_v3, %v2510_v63  ;;  %vm2493_vm2 = vcmp.ge.f32.partialorder %v2473_v29, 0.0  ;;  %v2513_v20 = vmul.f32 0.2, %v2473_v29  ;;  %v2393_v22 = vadd.f32 %v2312_v46, %v2187_v53  ;;  %v2344_v24 = vpop.f32.mrf.mxu3 }
 0x280   : > { %2550 = vst [vmem:[%s4226_s9 + $0x8] sm:$0xff] %v2530_v23  ;;  %v2531_v0 = vsel %vm2491_vm1, %v2471_v5, %v2511_v30  ;;  %vm2496_vm3 = vcmp.ge.f32.partialorder %v2476_v1, 0.0  ;;  %v2516_v48 = vmul.f32 0.2, %v2476_v1  ;;  %v2394_v54 = vadd.f32 %v2344_v24, %v2188_v42  ;;  %v2283_v61 = vpop.f32.mrf.mxu1 }
 0x281   : > { %2551 = vst [vmem:[%s4226_s9 + $0x10] sm:$0xff] %v2531_v0  ;;  %v2533_v33 = vsel %vm2493_vm2, %v2473_v29, %v2513_v20  ;;  %v2417_v19 = vmul.f32 %v4215_v41, %v2393_v22  ;;  %v2396_v9 = vadd.f32 %v2283_v61, %v2190_v60  ;;  %v2379_v58 = vpop.f32.mrf.mxu0  ;;  %v2195_v46 = vadd.f32 %v4178_v14, %v4136_v47 }
 0x282   : > { %v2536_v50 = vsel %vm2496_vm3, %v2476_v1, %v2516_v48  ;;  %2553 = vst [vmem:[%s4226_s9 + $0x20] sm:$0xff] %v2533_v33  ;;  %v2418_v25 = vmul.f32 %v4217_v39, %v2394_v54  ;;  %v2399_v62 = vadd.f32 %v2379_v58, %v2193_v12  ;;  %v2462_v12 = vpop.permute.xlu1 %2461  ;;  %v2196_v23 = vadd.f32 %v4180_v35, %v4138_v2 }
 0x283   : > { %2556 = vst [vmem:[%s4226_s9 + $0x38] sm:$0xff] %v2536_v50  ;;  %v2474_v4 = vadd.f32 %v2452_v59, %v2417_v19  ;;  %v2420_v28 = vmul.f32 %v4205_v11, %v2396_v9  ;;  %v2198_v24 = vadd.f32 %v4182_v55, %v4140_v6  ;;  %v2201_v54 = vadd.f32 %v4184_v26, %v4142_v37 }
 0x284   : > { %v2475_v36 = vadd.f32 %v2452_v59, %v2418_v25  ;;  %v2423_v40 = vmul.f32 %v4207_v8, %v2399_v62 }
 0x285   : > { %vm2494_vm4 = vcmp.ge.f32.partialorder %v2474_v4, 0.0  ;;  %v2514_v31 = vmul.f32 0.2, %v2474_v4  ;;  %v2477_v49 = vadd.f32 %v2457_v43, %v2420_v28  ;;  %v2467_v28 = vpop.permute.xlu2 %2466 }
 0x286   : > { %vm2495_vm5 = vcmp.ge.f32.partialorder %v2475_v36, 0.0  ;;  %v2515_v3 = vmul.f32 0.2, %v2475_v36  ;;  %v2480_v45 = vadd.f32 %v2457_v43, %v2423_v40  ;;  %v2315_v56 = vpop.f32.mrf.mxu2 }
 0x287   : > { %v2534_v13 = vsel %vm2494_vm4, %v2474_v4, %v2514_v31  ;;  %vm2497_vm6 = vcmp.ge.f32.partialorder %v2477_v49, 0.0  ;;  %v2517_v7 = vmul.f32 0.2, %v2477_v49  ;;  %v2397_v38 = vadd.f32 %v2315_v56, %v2191_v21  ;;  %v2347_v59 = vpop.f32.mrf.mxu3 }
 0x288   : > { %2554 = vst [vmem:[%s4226_s9 + $0x28] sm:$0xff] %v2534_v13  ;;  %v2535_v27 = vsel %vm2495_vm5, %v2475_v36, %v2515_v3  ;;  %vm2500_vm7 = vcmp.ge.f32.partialorder %v2480_v45, 0.0  ;;  %v2520_v16 = vmul.f32 0.2, %v2480_v45  ;;  %v2398_v53 = vadd.f32 %v2347_v59, %v2192_v17  ;;  %v2286_v42 = vpop.f32.mrf.mxu1 }
 0x289   : > { %2555 = vst [vmem:[%s4226_s9 + $0x30] sm:$0xff] %v2535_v27  ;;  %v2537_v15 = vsel %vm2497_vm6, %v2477_v49, %v2517_v7  ;;  %v2421_v32 = vmul.f32 %v4215_v41, %v2397_v38  ;;  %v2400_v5 = vadd.f32 %v2286_v42, %v2194_v34  ;;  %v2382_v10 = vpop.f32.mrf.mxu0  ;;  %v2199_v34 = vadd.f32 %v4196_v44, %v4144_v18 }
 0x28a   : > { %v2540_v60 = vsel %vm2500_vm7, %v2480_v45, %v2520_v16  ;;  %2557 = vst [vmem:[%s4226_s9 + $0x40] sm:$0xff] %v2537_v15  ;;  %v2422_v63 = vmul.f32 %v4217_v39, %v2398_v53  ;;  %v2403_v29 = vadd.f32 %v2382_v10, %v2197_v51  ;;  %v2200_v51 = vadd.f32 %v4201_v52, %v4146_v57 }
 0x28b   : > { %2560 = vst [vmem:[%s4226_s9 + $0x58] sm:$0xff] %v2540_v60  ;;  %v2478_v30 = vadd.f32 %v2457_v43, %v2421_v32  ;;  %v2424_v1 = vmul.f32 %v4205_v11, %v2400_v5 }
 0x28c   : > { %v2479_v20 = vadd.f32 %v2457_v43, %v2422_v63  ;;  %v2427_v22 = vmul.f32 %v4207_v8, %v2403_v29 }
 0x28d   : > { %vm2498_vm8 = vcmp.ge.f32.partialorder %v2478_v30, 0.0  ;;  %v2518_v0 = vmul.f32 0.2, %v2478_v30  ;;  %v2481_v48 = vadd.f32 %v2462_v12, %v2424_v1 }
 0x28e   : > { %vm2499_vm9 = vcmp.ge.f32.partialorder %v2479_v20, 0.0  ;;  %v2519_v61 = vmul.f32 0.2, %v2479_v20  ;;  %v2484_v47 = vadd.f32 %v2462_v12, %v2427_v22  ;;  %v2318_v14 = vpop.f32.mrf.mxu2 }
 0x28f   : > { %v2538_v33 = vsel %vm2498_vm8, %v2478_v30, %v2518_v0  ;;  %vm2501_vm10 = vcmp.ge.f32.partialorder %v2481_v48, 0.0  ;;  %v2521_v2 = vmul.f32 0.2, %v2481_v48  ;;  %v2401_v35 = vadd.f32 %v2318_v14, %v2195_v46  ;;  %v2350_v43 = vpop.f32.mrf.mxu3 }
 0x290   : > { %2558 = vst [vmem:[%s4226_s9 + $0x48] sm:$0xff] %v2538_v33  ;;  %v2539_v6 = vsel %vm2499_vm9, %v2479_v20, %v2519_v61  ;;  %vm2504_vm11 = vcmp.ge.f32.partialorder %v2484_v47, 0.0  ;;  %v2524_v55 = vmul.f32 0.2, %v2484_v47  ;;  %v2402_v19 = vadd.f32 %v2350_v43, %v2196_v23  ;;  %v2289_v9 = vpop.f32.mrf.mxu1 }
 0x291   : > { %2559 = vst [vmem:[%s4226_s9 + $0x50] sm:$0xff] %v2539_v6  ;;  %v2541_v37 = vsel %vm2501_vm10, %v2481_v48, %v2521_v2  ;;  %v2425_v26 = vmul.f32 %v4215_v41, %v2401_v35  ;;  %v2404_v58 = vadd.f32 %v2289_v9, %v2198_v24  ;;  %v2385_v50 = vpop.f32.mrf.mxu0 }
 0x292   : > { %v2544_v25 = vsel %vm2504_vm11, %v2484_v47, %v2524_v55  ;;  %2561 = vst [vmem:[%s4226_s9 + $0x60] sm:$0xff] %v2541_v37  ;;  %v2426_v62 = vmul.f32 %v4217_v39, %v2402_v19  ;;  %v2407_v4 = vadd.f32 %v2385_v50, %v2201_v54 }
 0x293   : > { %2564 = vst [vmem:[%s4226_s9 + $0x78] sm:$0xff] %v2544_v25  ;;  %v2482_v21 = vadd.f32 %v2462_v12, %v2425_v26  ;;  %v2428_v17 = vmul.f32 %v4205_v11, %v2404_v58 }
 0x294   : > { %v2483_v36 = vadd.f32 %v2462_v12, %v2426_v62  ;;  %v2431_v40 = vmul.f32 %v4207_v8, %v2407_v4 }
 0x295   : > { %vm2502_vm12 = vcmp.ge.f32.partialorder %v2482_v21, 0.0  ;;  %v2522_v31 = vmul.f32 0.2, %v2482_v21  ;;  %v2485_v49 = vadd.f32 %v2467_v28, %v2428_v17 }
 0x296   : > { %vm2503_vm13 = vcmp.ge.f32.partialorder %v2483_v36, 0.0  ;;  %v2523_v3 = vmul.f32 0.2, %v2483_v36  ;;  %v2488_v45 = vadd.f32 %v2467_v28, %v2431_v40  ;;  %v2321_v56 = vpop.f32.mrf.mxu2 }
 0x297   : > { %v2542_v11 = vsel %vm2502_vm12, %v2482_v21, %v2522_v31  ;;  %vm2505_vm14 = vcmp.ge.f32.partialorder %v2485_v49, 0.0  ;;  %v2525_v13 = vmul.f32 0.2, %v2485_v49  ;;  %v2405_v8 = vadd.f32 %v2321_v56, %v2199_v34  ;;  %v2353_v7 = vpop.f32.mrf.mxu3 }
 0x298   : > { %2562 = vst [vmem:[%s4226_s9 + $0x68] sm:$0xff] %v2542_v11  ;;  %v2543_v18 = vsel %vm2503_vm13, %v2483_v36, %v2523_v3  ;;  %vm2508_vm15 = vcmp.ge.f32.partialorder %v2488_v45, 0.0  ;;  %v2528_v44 = vmul.f32 0.2, %v2488_v45  ;;  %v2406_v38 = vadd.f32 %v2353_v7, %v2200_v51 }
 0x299   : > { %2563 = vst [vmem:[%s4226_s9 + $0x70] sm:$0xff] %v2543_v18  ;;  %v2545_v57 = vsel %vm2505_vm14, %v2485_v49, %v2525_v13  ;;  %v2429_v52 = vmul.f32 %v4215_v41, %v2405_v8 }
 0x29a   : > { %v2548_v59 = vsel %vm2508_vm15, %v2488_v45, %v2528_v44  ;;  %2565 = vst [vmem:[%s4226_s9 + $0x80] sm:$0xf] %v2545_v57  ;;  %v2430_v27 = vmul.f32 %v4217_v39, %v2406_v38 }
 0x29b   : > { %2568 = vst [vmem:[%s4226_s9 + $0x98] sm:$0xf] %v2548_v59  ;;  %v2486_v16 = vadd.f32 %v2467_v28, %v2429_v52 }
 0x29c   : > { %v2487_v53 = vadd.f32 %v2467_v28, %v2430_v27 }
 0x29d   : > { %vm2506_vm0 = vcmp.ge.f32.partialorder %v2486_v16, 0.0  ;;  %v2526_v42 = vmul.f32 0.2, %v2486_v16 }
 0x29e   : > { %vm2507_vm1 = vcmp.ge.f32.partialorder %v2487_v53, 0.0  ;;  %v2527_v15 = vmul.f32 0.2, %v2487_v53 }
 0x29f   : > { %v2546_v32 = vsel %vm2506_vm0, %v2486_v16, %v2526_v42 }
 0x2a0   : > { %2566 = vst [vmem:[%s4226_s9 + $0x88] sm:$0xf] %v2546_v32  ;;  %v2547_v5 = vsel %vm2507_vm1, %v2487_v53, %v2527_v15 }
 0x2a1   : > { %2567 = vst [vmem:[%s4226_s9 + $0x90] sm:$0xf] %v2547_v5 }
 0x2a2 PF: > { %s22_s29 = sadd.s32 1, %s3142_s29  }
 0x2a3   : > { %p19_p7 = scmp.ge.s32.totalorder %s22_s29, 4  }
 0x2a5   :  { %21 = sbr.rel (!%p19_p7) target bundleno = 5 (0x5), region = 115 }
 0x2aa   :  { %2590 = vsyncpa [#allocation4], 1 }
 0x2ab   :  { %2592 = vsyncpa [#allocation4 + $0x1], 1 }
 0x2ac   :  { %2593 = vsyncpa [#allocation6], 1 }
 0x2ad   :  { %2594 = vsyncpa [#allocation9], 1 }

</bundles_post_ra>
